<compile_context>
chip_gen: v5e
topology: v5e:2x2
jax: 0.10.0
libtpu: 0.0.40
codegen_flags: <defaults>
</compile_context>

<pallas_src>
import jax
import jax.numpy as jnp
from jax.experimental import pallas as pl
from jax.experimental.pallas import tpu as pltpu

EPS = 1e-5


def mlp_head_kernel(x_ref, w1_ref, gamma_ref, beta_ref, w2_ref, b2_ref, o_ref):
    """One (parallel split p, hidden tile j) grid step.

    x_ref:     [B, in_dim]      resident (constant index, single-buffered)
    w1_ref:    [t_h, in_dim]    streamed, PyTorch layout -> contiguous rows
    gamma_ref: [1, t_h]         streamed BN weight tile
    beta_ref:  [1, t_h]         streamed BN bias tile
    w2_ref:    [t_h, out_dim]   streamed (= linear2.weight.T row slice)
    b2_ref:    [1, out_dim]     resident
    o_ref:     [1, B, out_dim]  resident f32 partial accumulator for split p
    """
    p = pl.program_id(0)   # parallel split of the hidden axis
    j = pl.program_id(1)   # hidden-tile step within the split ("arbitrary")

    @pl.when(j == 0)
    def _init():
        # Accumulate straight into the resident f32 output block; fold the
        # Linear2 bias into the p == 0 partial so no epilogue add is needed.
        b2b = jnp.broadcast_to(b2_ref[...], o_ref.shape[1:])
        o_ref[0] = jnp.where(p == 0, b2b, jnp.zeros_like(b2b))

    # In-kernel bf16 casts (no wrapper-side HBM cast round trip).
    x = x_ref[...].astype(jnp.bfloat16)        # [B, in_dim]
    w1t = w1_ref[...].astype(jnp.bfloat16)     # [t_h, in_dim]

    # ---- Linear 1 (MXU, f32 accumulate), contracting in_dim of both operands.
    #      b1 is omitted: exactly cancelled by training-mode BN mean subtraction.
    h = jax.lax.dot_general(x, w1t, (((1,), (1,)), ((), ())),
                            preferred_element_type=jnp.float32)   # [B, t_h]

    # ---- BatchNorm1d (training mode): one-pass batch stats per hidden feature.
    inv_n = 1.0 / h.shape[0]
    s1 = jnp.sum(h, axis=0, keepdims=True)        # [1, t_h]
    s2 = jnp.sum(h * h, axis=0, keepdims=True)    # [1, t_h]
    mean = s1 * inv_n
    var = jnp.maximum(s2 * inv_n - mean * mean, 0.0)   # clamp fp cancellation

    # Fold BN into one per-feature scale/shift (2 VPU ops over the [B, t_h] tile).
    scale = gamma_ref[...] * jax.lax.rsqrt(var + EPS)
    shift = beta_ref[...] - mean * scale

    # ---- BN apply + ReLU (VPU) ----
    hr = jnp.maximum(h * scale + shift, 0.0)

    # ---- Linear 2 partial product, accumulated into the resident output ----
    o_ref[0] = o_ref[0] + jnp.dot(hr.astype(jnp.bfloat16),
                                  w2_ref[...].astype(jnp.bfloat16),
                                  preferred_element_type=jnp.float32)


def _pick_hidden_tile(hidden_per_split, t_h):
    if t_h is not None:
        assert hidden_per_split % t_h == 0, "t_h must divide hidden_dim // num_splits"
        return t_h
    # Prefer multiples of 256 (v6e/v7x MXUs are 2x256x256); 128 suffices on v5e.
    for cand in (512, 256, 128):
        if hidden_per_split % cand == 0:
            return cand
    return hidden_per_split


def mlp_head(x, w1, b1, gamma, beta, w2, b2, *, t_h=None, num_splits=2,
             w_buffers=2):
    """MLPHead forward.  Returns [B, out_dim] f32.

    x:     [B, in_dim]
    w1:    [hidden_dim, in_dim]   (PyTorch nn.Linear weight layout)
    b1:    [1, hidden_dim]        accepted but cancelled by training-mode BN
    gamma: [1, hidden_dim], beta: [1, hidden_dim]
    w2:    [hidden_dim, out_dim]  (= linear2.weight.T, transposed once at setup)
    b2:    [1, out_dim]
    """
    # TODO(synk): eval-mode BatchNorm (running mean/var) would need b1
    # reinstated and scale/shift computed from the running statistics.
    del b1
    B, in_dim = x.shape
    hidden_dim = w1.shape[0]
    out_dim = w2.shape[1]
    assert hidden_dim % num_splits == 0
    hidden_per_split = hidden_dim // num_splits
    t_h = _pick_hidden_tile(hidden_per_split, t_h)
    steps = hidden_per_split // t_h

    def itemsize(a):
        return jnp.dtype(a.dtype).itemsize

    # VMEM budget: single-buffered residents + w_buffers-deep weight streams
    # + headroom for the f32 [B, t_h] intermediates.  Capped at 64 MiB (v7x).
    vmem_est = (B * in_dim * itemsize(x)
                + w_buffers * t_h * in_dim * itemsize(w1)
                + w_buffers * t_h * out_dim * itemsize(w2)
                + 2 * w_buffers * t_h * 4
                + out_dim * 4
                + B * out_dim * 4
                + 4 * B * t_h * 4)
    vmem_limit = int(min(64 << 20, max(2 * vmem_est, 32 << 20)))

    flops = 2 * B * in_dim * hidden_dim + 2 * B * hidden_dim * out_dim
    bytes_accessed = (x.size * itemsize(x) + w1.size * itemsize(w1)
                      + w2.size * itemsize(w2)
                      + (gamma.size + beta.size + b2.size) * 4
                      + num_splits * B * out_dim * 4)
    cost = pl.CostEstimate(flops=flops, transcendentals=hidden_dim,
                           bytes_accessed=bytes_accessed)

    grid_spec = pltpu.PrefetchScalarGridSpec(
        num_scalar_prefetch=0,
        grid=(num_splits, steps),
        in_specs=[
            # x: constant index -> never re-fetched; one buffer saves VMEM.
            pl.BlockSpec((B, in_dim), lambda p, j: (0, 0),
                         pipeline_mode=pl.Buffered(1)),
            # W1 hidden tile: contiguous row slice of [hidden, in].
            pl.BlockSpec((t_h, in_dim), lambda p, j: (p * steps + j, 0),
                         pipeline_mode=pl.Buffered(w_buffers)),
            pl.BlockSpec((1, t_h), lambda p, j: (0, p * steps + j)),
            pl.BlockSpec((1, t_h), lambda p, j: (0, p * steps + j)),
            # W2 hidden tile: contiguous row slice of [hidden, out].
            pl.BlockSpec((t_h, out_dim), lambda p, j: (p * steps + j, 0),
                         pipeline_mode=pl.Buffered(w_buffers)),
            # b2: resident.
            pl.BlockSpec((1, out_dim), lambda p, j: (0, 0),
                         pipeline_mode=pl.Buffered(1)),
        ],
        out_specs=pl.BlockSpec((1, B, out_dim), lambda p, j: (p, 0, 0),
                               pipeline_mode=pl.Buffered(1)),
    )

    partials = pl.pallas_call(
        mlp_head_kernel,
        out_shape=jax.ShapeDtypeStruct((num_splits, B, out_dim), jnp.float32),
        grid_spec=grid_spec,
        compiler_params=pltpu.CompilerParams(
            dimension_semantics=("parallel", "arbitrary"),
            vmem_limit_bytes=vmem_limit),
        cost_estimate=cost,
    )(x, w1, gamma, beta, w2, b2)

    # One-line epilogue: sum per-split partials (b2 already folded into split 0).
    return jnp.sum(partials, axis=0)


def mlp_head_ref(x, w1, b1, gamma, beta, w2, b2):
    """Plain-JAX f32 reference matching the PyTorch forward (training-mode BN)."""
    h = x @ w1.T + b1
    mean = jnp.mean(h, axis=0, keepdims=True)
    var = jnp.mean((h - mean) ** 2, axis=0, keepdims=True)
    hn = (h - mean) / jnp.sqrt(var + EPS) * gamma + beta
    return jnp.maximum(hn, 0.0) @ w2 + b2


if __name__ == "__main__":
    # Module-default feature dims (in=512, hidden=1024, out=256), small batch.
    # B multiple of 16 (bf16 sublane packing); feature dims multiples of 256.
    B, in_dim, hidden_dim, out_dim = 32, 512, 1024, 256

    key = jax.random.PRNGKey(0)
    kx, kw1, kb1, kg, kbt, kw2, kb2 = jax.random.split(key, 7)

    x = jax.random.normal(kx, (B, in_dim), dtype=jnp.float32)
    w1 = jax.random.normal(kw1, (hidden_dim, in_dim), dtype=jnp.float32) * 0.03
    b1 = jax.random.normal(kb1, (1, hidden_dim), dtype=jnp.float32) * 0.01
    gamma = 1.0 + 0.1 * jax.random.normal(kg, (1, hidden_dim), dtype=jnp.float32)
    beta = 0.1 * jax.random.normal(kbt, (1, hidden_dim), dtype=jnp.float32)
    w2 = jax.random.normal(kw2, (hidden_dim, out_dim), dtype=jnp.float32) * 0.03
    b2 = jax.random.normal(kb2, (1, out_dim), dtype=jnp.float32) * 0.01

    # num_splits=2, t_h=256 -> grid (2, 2): exercises both the parallel split
    # and the streamed/accumulated hidden axis.
    out = mlp_head(x, w1, b1, gamma, beta, w2, b2, t_h=256, num_splits=2)
    out = jax.block_until_ready(out)

    ref = mlp_head_ref(x, w1, b1, gamma, beta, w2, b2)
    assert out.shape == (B, out_dim)
    # bf16 MXU operands with f32 accumulation -> loosened tolerance.
    assert jnp.allclose(out, ref, atol=5e-2, rtol=5e-2), "mismatch vs reference"

    print("KERNEL_OK")
</pallas_src>

<mosaic_0001>
module attributes {stable_mosaic.version = 11 : i64} {
  func.func @mlp_head_kernel(%arg0: i32, %arg1: i32, %arg2: memref<32x512xf32, #tpu.memory_space<vmem>>, %arg3: memref<256x512xf32, #tpu.memory_space<vmem>>, %arg4: memref<1x256xf32, #tpu.memory_space<vmem>>, %arg5: memref<1x256xf32, #tpu.memory_space<vmem>>, %arg6: memref<256x256xf32, #tpu.memory_space<vmem>>, %arg7: memref<1x256xf32, #tpu.memory_space<vmem>>, %arg8: memref<1x32x256xf32, #tpu.memory_space<vmem>>) attributes {dimension_semantics = [#tpu.dimension_semantics<parallel>, #tpu.dimension_semantics<arbitrary>], iteration_bounds = array<i64: 2, 2>, scalar_prefetch = 0 : i64, scratch_operands = 0 : i64, tpu.core_type = #tpu.core_type<tc>, window_params = [{pipeline_mode = #tpu.pipeline_mode<synchronous>, transform_indices = @transform_0, window_bounds = array<i64: 32, 512>}, {pipeline_mode = #tpu.pipeline_mode<double_buffered>, transform_indices = @transform_1, window_bounds = array<i64: 256, 512>}, {transform_indices = @transform_2, window_bounds = array<i64: 1, 256>}, {transform_indices = @transform_3, window_bounds = array<i64: 1, 256>}, {pipeline_mode = #tpu.pipeline_mode<double_buffered>, transform_indices = @transform_4, window_bounds = array<i64: 256, 256>}, {pipeline_mode = #tpu.pipeline_mode<synchronous>, transform_indices = @transform_5, window_bounds = array<i64: 1, 256>}, {pipeline_mode = #tpu.pipeline_mode<synchronous>, transform_indices = @transform_6, window_bounds = array<i64: 1, 32, 256>}]} {
    %c0_i32 = arith.constant 0 : i32
    %0 = arith.cmpi eq, %arg1, %c0_i32 : i32
    %1 = arith.extui %0 : i1 to i32
    %c0_i32_0 = arith.constant 0 : i32
    %2 = arith.cmpi ne, %1, %c0_i32_0 : i32
    scf.if %2 {
      %c0_24 = arith.constant 0 : index
      %c0_25 = arith.constant 0 : index
      %45 = vector.load %arg7[%c0_24, %c0_25] : memref<1x256xf32, #tpu.memory_space<vmem>>, vector<1x256xf32>
      %46 = vector.shape_cast %45 : vector<1x256xf32> to vector<1x256xf32>
      %47 = vector.broadcast %46 : vector<1x256xf32> to vector<32x256xf32>
      %c0_i32_26 = arith.constant 0 : i32
      %48 = arith.cmpi eq, %arg0, %c0_i32_26 : i32
      %cst_27 = arith.constant 0.000000e+00 : f32
      %49 = vector.broadcast %cst_27 : f32 to vector<32x256xf32>
      %50 = arith.select %48, %47, %49 : vector<32x256xf32>
      %c0_28 = arith.constant 0 : index
      %c0_29 = arith.constant 0 : index
      %c0_30 = arith.constant 0 : index
      %51 = vector.load %arg8[%c0_28, %c0_29, %c0_30] : memref<1x32x256xf32, #tpu.memory_space<vmem>>, vector<1x32x256xf32>
      %52 = vector.shape_cast %51 : vector<1x32x256xf32> to vector<32x256xf32>
      %53 = vector.shape_cast %50 : vector<32x256xf32> to vector<1x32x256xf32>
      tpu.vector_store %arg8[%c0_28, %c0_29, %c0_30], %53 {strides = array<i32>} : memref<1x32x256xf32, #tpu.memory_space<vmem>>, vector<1x32x256xf32>,
    } else {
    }
    %c0 = arith.constant 0 : index
    %c0_1 = arith.constant 0 : index
    %3 = vector.load %arg2[%c0, %c0_1] : memref<32x512xf32, #tpu.memory_space<vmem>>, vector<32x512xf32>
    %4 = arith.truncf %3 : vector<32x512xf32> to vector<32x512xbf16>
    %c0_2 = arith.constant 0 : index
    %c0_3 = arith.constant 0 : index
    %5 = vector.load %arg3[%c0_2, %c0_3] : memref<256x512xf32, #tpu.memory_space<vmem>>, vector<256x512xf32>
    %6 = arith.truncf %5 : vector<256x512xf32> to vector<256x512xbf16>
    %cst = arith.constant dense<0.000000e+00> : vector<32x256xf32>
    %7 = tpu.matmul %4, %6, %cst {dimension_numbers = #tpu.dot_dimension_numbers<[1], [1], [0], [0], [0, 0, 1, 0], [], []>} : vector<32x512xbf16>, vector<256x512xbf16>, vector<32x256xf32> -> vector<32x256xf32>
    %cst_4 = arith.constant dense<0.000000e+00> : vector<256xf32>
    %8 = vector.multi_reduction <add>, %7, %cst_4 [0] : vector<32x256xf32> to vector<256xf32>
    %9 = vector.shape_cast %8 : vector<256xf32> to vector<1x256xf32>
    %10 = arith.mulf %7, %7 : vector<32x256xf32>
    %cst_5 = arith.constant dense<0.000000e+00> : vector<256xf32>
    %11 = vector.multi_reduction <add>, %10, %cst_5 [0] : vector<32x256xf32> to vector<256xf32>
    %12 = vector.shape_cast %11 : vector<256xf32> to vector<1x256xf32>
    %cst_6 = arith.constant 3.125000e-02 : f32
    %13 = vector.broadcast %cst_6 : f32 to vector<1x256xf32>
    %14 = arith.mulf %9, %13 : vector<1x256xf32>
    %cst_7 = arith.constant 3.125000e-02 : f32
    %15 = vector.broadcast %cst_7 : f32 to vector<1x256xf32>
    %16 = arith.mulf %12, %15 : vector<1x256xf32>
    %17 = arith.mulf %14, %14 : vector<1x256xf32>
    %18 = arith.subf %16, %17 : vector<1x256xf32>
    %cst_8 = arith.constant 0.000000e+00 : f32
    %19 = vector.broadcast %cst_8 : f32 to vector<1x256xf32>
    %20 = arith.maximumf %18, %19 : vector<1x256xf32>
    %c0_9 = arith.constant 0 : index
    %c0_10 = arith.constant 0 : index
    %21 = vector.load %arg4[%c0_9, %c0_10] : memref<1x256xf32, #tpu.memory_space<vmem>>, vector<1x256xf32>
    %cst_11 = arith.constant 9.99999974E-6 : f32
    %22 = vector.broadcast %cst_11 : f32 to vector<1x256xf32>
    %23 = arith.addf %20, %22 : vector<1x256xf32>
    %24 = math.rsqrt %23 : vector<1x256xf32>
    %25 = arith.mulf %21, %24 : vector<1x256xf32>
    %c0_12 = arith.constant 0 : index
    %c0_13 = arith.constant 0 : index
    %26 = vector.load %arg5[%c0_12, %c0_13] : memref<1x256xf32, #tpu.memory_space<vmem>>, vector<1x256xf32>
    %27 = arith.mulf %14, %25 : vector<1x256xf32>
    %28 = arith.subf %26, %27 : vector<1x256xf32>
    %29 = vector.broadcast %25 : vector<1x256xf32> to vector<32x256xf32>
    %30 = arith.mulf %7, %29 : vector<32x256xf32>
    %31 = vector.broadcast %28 : vector<1x256xf32> to vector<32x256xf32>
    %32 = arith.addf %30, %31 : vector<32x256xf32>
    %cst_14 = arith.constant 0.000000e+00 : f32
    %33 = vector.broadcast %cst_14 : f32 to vector<32x256xf32>
    %34 = arith.maximumf %32, %33 : vector<32x256xf32>
    %c0_15 = arith.constant 0 : index
    %c0_16 = arith.constant 0 : index
    %c0_17 = arith.constant 0 : index
    %35 = vector.load %arg8[%c0_15, %c0_16, %c0_17] : memref<1x32x256xf32, #tpu.memory_space<vmem>>, vector<1x32x256xf32>
    %36 = vector.shape_cast %35 : vector<1x32x256xf32> to vector<32x256xf32>
    %37 = arith.truncf %34 : vector<32x256xf32> to vector<32x256xbf16>
    %c0_18 = arith.constant 0 : index
    %c0_19 = arith.constant 0 : index
    %38 = vector.load %arg6[%c0_18, %c0_19] : memref<256x256xf32, #tpu.memory_space<vmem>>, vector<256x256xf32>
    %39 = arith.truncf %38 : vector<256x256xf32> to vector<256x256xbf16>
    %cst_20 = arith.constant dense<0.000000e+00> : vector<32x256xf32>
    %40 = tpu.matmul %37, %39, %cst_20 {dimension_numbers = #tpu.dot_dimension_numbers<[1], [0], [0], [1], [0, 0, 1, 1], [], []>} : vector<32x256xbf16>, vector<256x256xbf16>, vector<32x256xf32> -> vector<32x256xf32>
    %41 = arith.addf %36, %40 : vector<32x256xf32>
    %c0_21 = arith.constant 0 : index
    %c0_22 = arith.constant 0 : index
    %c0_23 = arith.constant 0 : index
    %42 = vector.load %arg8[%c0_21, %c0_22, %c0_23] : memref<1x32x256xf32, #tpu.memory_space<vmem>>, vector<1x32x256xf32>
    %43 = vector.shape_cast %42 : vector<1x32x256xf32> to vector<32x256xf32>
    %44 = vector.shape_cast %41 : vector<32x256xf32> to vector<1x32x256xf32>
    tpu.vector_store %arg8[%c0_21, %c0_22, %c0_23], %44 {strides = array<i32>} : memref<1x32x256xf32, #tpu.memory_space<vmem>>, vector<1x32x256xf32>,
    return
  }
  func.func @transform_0(%arg0: i32, %arg1: i32) -> (i32, i32) {
    %c0_i32 = arith.constant 0 : i32
    %c0_i32_0 = arith.constant 0 : i32
    %c0_i32_1 = arith.constant 0 : i32
    return %c0_i32, %c0_i32_0 : i32, i32
  }
  func.func @transform_1(%arg0: i32, %arg1: i32) -> (i32, i32) {
    %c2_i32 = arith.constant 2 : i32
    %0 = arith.muli %arg0, %c2_i32 : i32
    %1 = arith.addi %0, %arg1 : i32
    %c0_i32 = arith.constant 0 : i32
    %c0_i32_0 = arith.constant 0 : i32
    return %1, %c0_i32 : i32, i32
  }
  func.func @transform_2(%arg0: i32, %arg1: i32) -> (i32, i32) {
    %c2_i32 = arith.constant 2 : i32
    %0 = arith.muli %arg0, %c2_i32 : i32
    %1 = arith.addi %0, %arg1 : i32
    %c0_i32 = arith.constant 0 : i32
    %c0_i32_0 = arith.constant 0 : i32
    return %c0_i32, %1 : i32, i32
  }
  func.func @transform_3(%arg0: i32, %arg1: i32) -> (i32, i32) {
    %c2_i32 = arith.constant 2 : i32
    %0 = arith.muli %arg0, %c2_i32 : i32
    %1 = arith.addi %0, %arg1 : i32
    %c0_i32 = arith.constant 0 : i32
    %c0_i32_0 = arith.constant 0 : i32
    return %c0_i32, %1 : i32, i32
  }
  func.func @transform_4(%arg0: i32, %arg1: i32) -> (i32, i32) {
    %c2_i32 = arith.constant 2 : i32
    %0 = arith.muli %arg0, %c2_i32 : i32
    %1 = arith.addi %0, %arg1 : i32
    %c0_i32 = arith.constant 0 : i32
    %c0_i32_0 = arith.constant 0 : i32
    return %1, %c0_i32 : i32, i32
  }
  func.func @transform_5(%arg0: i32, %arg1: i32) -> (i32, i32) {
    %c0_i32 = arith.constant 0 : i32
    %c0_i32_0 = arith.constant 0 : i32
    %c0_i32_1 = arith.constant 0 : i32
    return %c0_i32, %c0_i32_0 : i32, i32
  }
  func.func @transform_6(%arg0: i32, %arg1: i32) -> (i32, i32, i32) {
    %c0_i32 = arith.constant 0 : i32
    %c0_i32_0 = arith.constant 0 : i32
    %c0_i32_1 = arith.constant 0 : i32
    return %arg0, %c0_i32, %c0_i32_0 : i32, i32, i32
  }
}

</mosaic_0001>

<bundles_post_ra>
// kernel: tpu_custom_call.1
= control target key start
LH: loop header
LB: loop body
LE: loop exit
PB: predicated region body
PF: predicated region fallthrough
CT: control target
= control target key end

     0   :  { %s2441_s0 = inlined_call_operand.hbm [shape: f32[32,512], index: 0, kind: input, shape index: {}]   ;;  %s2442_s1 = inlined_call_operand.hbm [shape: f32[1024,512], index: 1, kind: input, shape index: {}]   ;;  %s2443_s2 = inlined_call_operand.hbm [shape: f32[1,1024], index: 2, kind: input, shape index: {}]   ;;  %s2444_s3 = inlined_call_operand.hbm [shape: f32[1,1024], index: 3, kind: input, shape index: {}]   ;;  %s2445_s4 = inlined_call_operand.hbm [shape: f32[1024,256], index: 4, kind: input, shape index: {}]   ;;  %s2446_s5 = inlined_call_operand.hbm [shape: f32[1,256], index: 5, kind: input, shape index: {}]   ;;  %s2447_s6 = inlined_call_operand.hbm [shape: f32[2,32,256], index: 6, kind: output, shape index: {}]  }
   0x1   :  { %2454 = sst [smem:[#allocation28_spill]] %s2441_s0 }
   0x2   :  { %2455 = sst [smem:[#allocation29_spill]] %s2442_s1 }
   0x3   :  { %2456 = sst [smem:[#allocation30_spill]] %s2443_s2 }
   0x4   :  { %2457 = sst [smem:[#allocation31_spill]] %s2444_s3 }
   0x5   :  { %2458 = sst [smem:[#allocation32_spill]] %s2446_s5 }
   0x6   :  { %2459 = sst [smem:[#allocation33_spill]] %s2447_s6 }
   0x7   :  { %11 = vsyncpa [#allocation3], 0 }
   0x8   :  { %12 = vsyncpa [#allocation6], 0 }
   0x9   :  { %14 = vsyncpa [#allocation6 + $0x1], 0 }
   0xa   :  { %15 = vsyncpa [#allocation9], 0 }
   0xb   :  { %17 = vsyncpa [#allocation9 + $0x1], 0 }
   0xc   :  { %18 = vsyncpa [#allocation12], 0 }
   0xd   :  { %19 = vsyncpa [#allocation4], 0  ;;  %s1885_s21 = smov 0   ;;  %s1887_s22 = smov 0  }
   0xe   :  { %s1889_s23 = smov 0   ;;  %s1891_s24 = smov 0  }
   0xf   :  { %s1893_s25 = smov 0   ;;  %s1895_s26 = smov 0  }
  0x10   :  { %s1897_s27 = smov 0   ;;  %s1899_s28 = smov 0  }
  0x11   :  { %s1901_s29 = smov 0   ;;  %s1903_s30 = smov 0  }
  0x12 LB: > { %2460 = sst [smem:[#allocation19_spill]] %s1819_s25  ;;  %s34_s7 = sadd.s32 1, %s1831_s28  ;;  %s1839_s30 = sphi %s1903_s30, %s25_s30   ;;  %s1835_s29 = sphi %s1901_s29, %s2493_s29   ;;  %s1831_s28 = sphi %s1899_s28, %s2492_s28   ;;  %s1827_s27 = sphi %s1897_s27, %s2491_s27   ;;  %s1823_s26 = sphi %s1895_s26, %s2490_s26   ;;  %s1819_s25 = sphi %s1893_s25, %s2489_s25   ;;  %s1815_s24 = sphi %s1891_s24, %s2497_s24   ;;  %s1811_s23 = sphi %s1889_s23, %s2496_s23   ;;  %s1807_s22 = sphi %s1887_s22, %s2495_s22   ;;  %s1803_s21 = sphi %s1885_s21, %s2494_s21  }
  0x13   : > { %2461 = sst [smem:[#allocation20_spill]] %s1823_s26  ;;  %s37_s8 = sadd.s32 1, %s1835_s29 }
  0x14   : > { %2462 = sst [smem:[#allocation21_spill]] %s1827_s27  ;;  %p35_p0 = scmp.ge.s32.totalorder %s34_s7, 2 }
  0x15   : > { %2463 = sst [smem:[#allocation22_spill]] %s1831_s28  ;;  %s1352_s9 = sshll.u32 %s1835_s29, 1 }
  0x16   : > { %2464 = sst [smem:[#allocation23_spill]] %s1835_s29  ;;  %s1939_s10 = sadd.s32 %s1831_s28, %s1352_s9 }
  0x17   : > { %s69_s11 = sadd.s32 1, %s1819_s25  ;;  %s2499_s7 = smov (%p35_p0, %s34_s7), 0 }
  0x18   : > { %2465 = sst [smem:[#allocation24_spill]] %s2499_s7  ;;  %s2501_s8 = smov (!%p35_p0, %s37_s8), %s1835_s29 }
  0x19   : > { %p76_p1 = scmp.ne.s32.totalorder %s1819_s25, %s1815_s24  ;;  %p77_p2 = scmp.eq.s32.totalorder %s1839_s30, 0 }
  0x1a   : > { %p39_p3 = scmp.ge.s32.totalorder %s2501_s8, 2  ;;  %p1437_p5 = scmp.lt.s32.totalorder %s1839_s30, 4 }
  0x1b   : > { %p1948_p4 = por %p77_p2, %p76_p1  ;;  %s269_s18 = sand.u32 1, %s1839_s30  }
  0x1c   : > { %s2503_s8 = smov (%p39_p3, %s2501_s8), 0  ;;  %s1966_s19 = sand.u32 1, %s1819_s25  }
  0x1d   : > { %2467 = sst [smem:[#allocation25_spill]] %s2503_s8  ;;  %s1353_s13 = sshll.u32 %s2503_s8, 1 }
  0x1e   : > { %s203_s14 = ssub.s32 %s1835_s29, %s2503_s8  ;;  %s65_s15 = sadd.s32 %s1353_s13, %s2499_s7 }
  0x1f   : > { %p1959_p6 = scmp.eq.s32.totalorder %s203_s14, 0  ;;  %s66_s17 = ssub.s32 %s1939_s10, %s65_s15 }
  0x20   : > { %p67_p7 = scmp.eq.s32.totalorder %s66_s17, 0  ;;  %s1393_s20 = sshll.u32 %s1939_s10, 10 }
  0x21   : > { %s1364_s28 = sshll.u32 %s1966_s19, 10  ;;  %s2470_s1 = sld [smem:[#allocation29_spill]] }
  0x22   : > { %s1970_s9 = scalar_select %p67_p7, %s1819_s25, %s69_s11  }
  0x23   : > { %s273_s7 = scalar_lea.vmem [#allocation5], %s1364_s28  ;;  %p1980_p8 = pnand %p1437_p5, %p1948_p4 }
  0x24   : > { %2469 = sst [smem:[#allocation26_spill]] %s1970_s9  ;;  %s284_s6 = sshll.u32 %s273_s7, 4  ;;  %s285_s6 = int_to_ptr.vmem [resolvable:$true] %s284_s6 }
  0x25   : > { %s1371_s29 = sshll.u32 %s1939_s10, 1  ;;  %s1986_s8 = scalar_lea.sflag [#allocation6], %s269_s18 }
  0x26   : > { %s1841_s28 = smov 512   ;;  %s1842_s7 = smov 32  }
  0x27   : > { %s281_s13 = scalar_lea.hbm %s2470_s1, %s1393_s20  ;;  %s2472_s2 = sld [smem:[#allocation30_spill]] }
  0x28   : > { %s282_s14 = sshll.u32 %s281_s13, 4  ;;  %s2473_s3 = sld [smem:[#allocation31_spill]]  ;;  %s283_s14 = int_to_ptr.hbm [resolvable:$true] %s282_s14 }
  0x29   : > { %1425 = dma.hbm_to_vmem [thread:$0]  (!%p1980_p8), %s283_s14, 16384, %s285_s6, %s1986_s8, %s1841_s28, %s1841_s28, %s1842_s7  }
  0x2a   : > { %s2474_s25 = sshll.u32 %s1966_s19, 1  ;;  %s2004_s6 = scalar_lea.sflag [#allocation9], %s269_s18 }
  0x2b   : > { %s319_s27 = scalar_lea.vmem [#allocation8], %s2474_s25  ;;  %s2010_s14 = sadd.s32 4294967295, %s1839_s30  }
  0x2c   : > { %s329_s26 = sshll.u32 %s319_s27, 4  ;;  %p82_p9 = scmp.ne.s32.totalorder %s1815_s24, %s1811_s23  ;;  %s330_s26 = int_to_ptr.vmem [resolvable:$true] %s329_s26 }
  0x2d   : > { %s1997_s20 = scalar_lea.hbm %s2472_s2, %s1371_s29  ;;  %p83_p10 = scmp.eq.s32.totalorder %s2010_s14, 0 }
  0x2e   : > { %s325_s1 = scalar_lea.hbm %s2473_s3, %s1371_s29  ;;  %s206_s11 = sadd.s32 1, %s1807_s22 }
  0x2f   : > { %s327_s9 = sshll.u32 %s325_s1, 4  ;;  %p2023_p11 = por %p83_p10, %p82_p9  ;;  %s328_s9 = int_to_ptr.hbm [resolvable:$true] %s327_s9 }
  0x30   : > { %1431 = dma.hbm_to_vmem [thread:$0]  (!%p1980_p8), %s328_s9, 32, %s330_s26, %s2004_s6  }
  0x31   : > { %s2019_s1 = scalar_select %p1959_p6, %s1807_s22, %s206_s11  }
  0x32   : > { %p216_p12 = scmp.ne.s32.totalorder %s1807_s22, %s1803_s21  ;;  %p217_p13 = scmp.eq.s32.totalorder %s2010_s14, 3 }
  0x33   : > { %2475 = sst [smem:[#allocation27_spill]] %s2019_s1  ;;  %p1360_p0 = scmp.ge.s32.totalorder %s1839_s30, 1 }
  0x34   : > { %p230_p1 = scmp.lt.s32.totalorder %s1839_s30, 5  ;;  %p2032_p2 = por %p217_p13, %p216_p12 }
  0x35   : > { %s2478_s0 = sld [smem:[#allocation28_spill]]  ;;  %s1843_s12 = smov [#allocation2]  }
  0x36   : > { %p2039_p3 = pnand %p1360_p0, %p230_p1  ;;  %s2480_s5 = sld [smem:[#allocation32_spill]] }
  0x37   : > { %s243_s17 = sshll.u32 %s1843_s12, 4  ;;  %s1844_s13 = smov [#allocation11]   ;;  %s244_s17 = int_to_ptr.vmem [resolvable:$true] %s243_s17 }
  0x38   : > { %p1415_p4 = pneg %p2039_p3  ;;  %s258_s11 = sshll.u32 %s1844_s13, 4  ;;  %s259_s11 = int_to_ptr.vmem [resolvable:$true] %s258_s11 }
  0x39   : > { %s306_s23 = sshll.u32 %s1997_s20, 4  ;;  %s2481_s27 = sshll.u32 %s1966_s19, 1  ;;  %s307_s23 = int_to_ptr.hbm [resolvable:$true] %s306_s23 }
  0x3a   : > { %p1416_p5 = pnand %p1415_p4, %p83_p10  ;;  %s298_s21 = scalar_lea.vmem [#allocation7], %s2481_s27 }
  0x3b   : > { %s241_s16 = sshll.u32 %s2478_s0, 4  ;;  %s308_s9 = sshll.u32 %s298_s21, 4  ;;  %s242_s16 = int_to_ptr.hbm [resolvable:$true] %s241_s16  ;;  %s309_s9 = int_to_ptr.vmem [resolvable:$true] %s308_s9 }
  0x3c   : > { %s256_s29 = sshll.u32 %s2480_s5, 4  ;;  %s1375_s12 = sshll.u32 %s1966_s19, 9  ;;  %s257_s29 = int_to_ptr.hbm [resolvable:$true] %s256_s29 }
  0x3d   : > { %1418 = dma.hbm_to_vmem [thread:$0]  (!%p1416_p5), %s242_s16, 2048, %s244_s17, [#allocation3], %s1841_s28, %s1841_s28, %s1842_s7  }
  0x3e   : > { %1421 = dma.hbm_to_vmem [thread:$0]  (!%p1416_p5), %s257_s29, 32, %s259_s11, [#allocation12]  }
  0x3f   : > { %1428 = dma.hbm_to_vmem [thread:$0]  (!%p1980_p8), %s307_s23, 32, %s309_s9, %s1986_s8  }
  0x40   : > { %s1395_s0 = sshll.u32 %s1939_s10, 9  ;;  %s340_s3 = scalar_lea.vmem [#allocation10], %s1375_s12 }
  0x41   : > { %s348_s20 = scalar_lea.hbm %s2445_s4, %s1395_s0  ;;  %s351_s5 = sshll.u32 %s340_s3, 4  ;;  %s352_s5 = int_to_ptr.vmem [resolvable:$true] %s351_s5 }
  0x42   : > { %s349_s1 = sshll.u32 %s348_s20, 4  ;;  %s1845_s28 = smov 256   ;;  %s350_s1 = int_to_ptr.hbm [resolvable:$true] %s349_s1 }
  0x43   : > { %s1846_s7 = smov 16   ;;  %363 = sbr.rel (%p2039_p3) target bundleno = 634 (0x27a), region = 44 }
  0x44   : > { %1434 = dma.hbm_to_vmem [thread:$0]  (!%p1980_p8), %s350_s1, 8192, %s352_s5, %s2004_s6, %s1845_s28, %s1845_s28, %s1846_s7  }
  0x48   : > { %1782 = dma.done.wait (%p83_p10), [#allocation3], 2048  }
  0x49   : > { %1784 = vsyncadd (%p83_p10), [#allocation3], 4294965248  ;;  %s370_s0 = sand.u32 1, %s2010_s14   ;;  %s372_s2 = sand.u32 1, %s1815_s24  }
  0x4a   : > { %s1382_s3 = sshll.u32 %s372_s2, 10  ;;  %s371_s10 = scalar_lea.sflag [#allocation6], %s370_s0 }
  0x4b   : > { %s2075_s19 = scalar_lea.vmem [#allocation5], %s1382_s3 }
  0x4c   : > { %1786 = dma.done.wait (%p2023_p11), %s371_s10, 16416  }
  0x4d   : > { %1788 = vsyncadd (%p2023_p11), %s371_s10, 4294950880  ;;  %s1383_s5 = sshll.u32 %s372_s2, 1  ;;  %s391_s8 = scalar_lea.sflag [#allocation9], %s370_s0 }
  0x4e   : > { %s2081_s15 = scalar_lea.vmem [#allocation7], %s1383_s5  ;;  %s2083_s6 = scalar_lea.vmem [#allocation8], %s1383_s5 }
  0x4f   : > { %1790 = dma.done.wait (%p2023_p11), %s391_s8, 8224  }
  0x50   : > { %1792 = vsyncadd (%p2023_p11), %s391_s8, 4294959072  ;;  %s1385_s1 = sshll.u32 %s372_s2, 9 }
  0x51   : > { %s2089_s16 = scalar_lea.vmem [#allocation10], %s1385_s1 }
  0x52   : > { %1794 = dma.done.wait (%p83_p10), [#allocation12], 32  }
  0x53   : > { %1796 = vsyncadd (%p83_p10), [#allocation12], 4294967264  ;;  %s2482_s18 = sld [smem:[#allocation20_spill]] }
  0x59   : > { %p1387_p6 = scmp.ne.s32.totalorder %s2482_s18, 0 }
  0x5a   : > { %s2483_s29 = sld [smem:[#allocation21_spill]] (!%p1387_p6) }
  0x5b   : > { %464 = sbr.rel (%p1387_p6) target bundleno = 111 (0x6f), region = 72 }
  0x60   : > { %v465_v0 = vld [vmem:[#allocation11] sm:$0x3]  ;;  %p471_p7 = scmp.eq.s32.totalorder %s2483_s29, 0 }
  0x61   : > { %v467_v1 = vperm.slane %v465_v0, 0  ;;  %v468_v3 = vperm.slane %v465_v0, 1 }
  0x62   : > { %s472_s17 = scalar_select %p471_p7, 1, 0 }
  0x64   : > { %v473_v2 = vstv %s472_s17 }
  0x65   : > { %vm474_vm0 = vcmp.eq.s32.totalorder %v473_v2, 1 }
  0x66   : > { %v475_v4 = vsel %vm474_vm0, %v467_v1, 0.0  ;;  %v476_v5 = vsel %vm474_vm0, %v468_v3, 0.0 }
  0x67   : > { %477 = vst [vmem:[#allocation13] sm:$0xff] %v475_v4 }
  0x68   : > { %479 = vst [vmem:[#allocation13 + $0x10] sm:$0xff] %v475_v4 }
  0x69   : > { %481 = vst [vmem:[#allocation13 + $0x20] sm:$0xff] %v475_v4 }
  0x6a   : > { %483 = vst [vmem:[#allocation13 + $0x30] sm:$0xff] %v475_v4 }
  0x6b   : > { %478 = vst [vmem:[#allocation13 + $0x8] sm:$0xff] %v476_v5 }
  0x6c   : > { %480 = vst [vmem:[#allocation13 + $0x18] sm:$0xff] %v476_v5 }
  0x6d   : > { %482 = vst [vmem:[#allocation13 + $0x28] sm:$0xff] %v476_v5 }
  0x6e   : > { %484 = vst [vmem:[#allocation13 + $0x38] sm:$0xff] %v476_v5 }
  0x6f PF: > { %v565_v6 = vld [vmem:[%s2075_s19 + $0x1c0] sm:$0xff]  ;;  %v566_v8 = vld [vmem:[%s2075_s19 + $0x1c8] sm:$0xff]  ;;  %v567_v11 = vld [vmem:[%s2075_s19 + $0x1d0] sm:$0xff]  ;;  %vm933_vm6 = vcmask 1040384   ;;  %s2484_s14 = sld [smem:[#allocation21_spill]]  ;;  %s1847_s12 = smov [#allocation13]  }
  0x70   : > { %v569_v7 = vld [vmem:[%s2075_s19 + $0x1e0] sm:$0xff]  ;;  %v570_v10 = vld [vmem:[%s2075_s19 + $0x1e8] sm:$0xff]  ;;  %v571_v12 = vld [vmem:[%s2075_s19 + $0x1f0] sm:$0xff]  ;;  %s2485_s27 = sld [smem:[#allocation33_spill]]  ;;  %s1188_s13 = sshll.u32 %s1847_s12, 4  ;;  %s1189_s13 = int_to_ptr.vmem [resolvable:$true] %s1188_s13 }
  0x71   : > { %v665_v9 = vpack.c.bf16 %v569_v7, %v565_v6  ;;  %v666_v13 = vpack.c.bf16 %v570_v10, %v566_v8  ;;  %v667_v14 = vpack.c.bf16 %v571_v12, %v567_v11  ;;  %v568_v15 = vld [vmem:[%s2075_s19 + $0x1d8] sm:$0xff]  ;;  %v557_v18 = vld [vmem:[%s2075_s19 + $0x180] sm:$0xff]  ;;  %v558_v20 = vld [vmem:[%s2075_s19 + $0x188] sm:$0xff] }
  0x72   : > { %v572_v16 = vld [vmem:[%s2075_s19 + $0x1f8] sm:$0xff]  ;;  %v561_v19 = vld [vmem:[%s2075_s19 + $0x1a0] sm:$0xff]  ;;  %v562_v21 = vld [vmem:[%s2075_s19 + $0x1a8] sm:$0xff] }
  0x73   : > { %701 = vmatpush.bf16.xpose.msra.mxu0 %v665_v9  ;;  %v668_v17 = vpack.c.bf16 %v572_v16, %v568_v15  ;;  %720 = vmatpush.bf16.xpose.msra.mxu1 %v666_v13  ;;  %v559_v22 = vld [vmem:[%s2075_s19 + $0x190] sm:$0xff]  ;;  %v560_v24 = vld [vmem:[%s2075_s19 + $0x198] sm:$0xff]  ;;  %v661_v26 = vpack.c.bf16 %v561_v19, %v557_v18  ;;  %v662_v27 = vpack.c.bf16 %v562_v21, %v558_v20  ;;  %v549_v30 = vld [vmem:[%s2075_s19 + $0x140] sm:$0xff] }
  0x74   : > { %739 = vmatpush.bf16.xpose.msra.mxu2 %v667_v14  ;;  %v563_v23 = vld [vmem:[%s2075_s19 + $0x1b0] sm:$0xff]  ;;  %v564_v25 = vld [vmem:[%s2075_s19 + $0x1b8] sm:$0xff]  ;;  %v553_v31 = vld [vmem:[%s2075_s19 + $0x160] sm:$0xff] }
  0x75   : > { %758 = vmatpush.bf16.xpose.msra.mxu3 %v668_v17  ;;  %v663_v28 = vpack.c.bf16 %v563_v23, %v559_v22  ;;  %v664_v29 = vpack.c.bf16 %v564_v25, %v560_v24  ;;  %v550_v32 = vld [vmem:[%s2075_s19 + $0x148] sm:$0xff]  ;;  %v551_v34 = vld [vmem:[%s2075_s19 + $0x150] sm:$0xff]  ;;  %v552_v36 = vld [vmem:[%s2075_s19 + $0x158] sm:$0xff]  ;;  %v657_v38 = vpack.c.bf16 %v553_v31, %v549_v30  ;;  %s1396_s25 = sshll.u32 %s2484_s14, 6 }
  0x76   : > { %v554_v33 = vld [vmem:[%s2075_s19 + $0x168] sm:$0xff]  ;;  %v555_v35 = vld [vmem:[%s2075_s19 + $0x170] sm:$0xff]  ;;  %v556_v37 = vld [vmem:[%s2075_s19 + $0x178] sm:$0xff]  ;;  %s2486_s9 = smov %s2485_s27  ;;  %s1187_s21 = scalar_lea.hbm %s2485_s27, %s1396_s25 }
  0x77   : > { %v658_v39 = vpack.c.bf16 %v554_v33, %v550_v32  ;;  %v659_v40 = vpack.c.bf16 %v555_v35, %v551_v34  ;;  %v660_v41 = vpack.c.bf16 %v556_v37, %v552_v36  ;;  %v541_v42 = vld [vmem:[%s2075_s19 + $0x100] sm:$0xff]  ;;  %v542_v44 = vld [vmem:[%s2075_s19 + $0x108] sm:$0xff]  ;;  %v543_v46 = vld [vmem:[%s2075_s19 + $0x110] sm:$0xff]  ;;  %s1190_s20 = sshll.u32 %s1187_s21, 4  ;;  %s1733_s3 = scalar_lea.hbm %s2486_s9, 128  ;;  %s1191_s20 = int_to_ptr.hbm [resolvable:$true] %s1190_s20 }
  0x78   : > { %v545_v43 = vld [vmem:[%s2075_s19 + $0x120] sm:$0xff]  ;;  %v546_v45 = vld [vmem:[%s2075_s19 + $0x128] sm:$0xff]  ;;  %v547_v47 = vld [vmem:[%s2075_s19 + $0x130] sm:$0xff]  ;;  %s1727_s28 = sshra.s32 %s1191_s20, 4  ;;  %s1728_s28 = int_to_ptr.hbm [resolvable:$true] %s1727_s28 }
  0x79   : > { %v544_v48 = vld [vmem:[%s2075_s19 + $0x118] sm:$0xff]  ;;  %v653_v50 = vpack.c.bf16 %v545_v43, %v541_v42  ;;  %v654_v51 = vpack.c.bf16 %v546_v45, %v542_v44  ;;  %v655_v52 = vpack.c.bf16 %v547_v47, %v543_v46  ;;  %v533_v54 = vld [vmem:[%s2075_s19 + $0xc0] sm:$0xff]  ;;  %v534_v56 = vld [vmem:[%s2075_s19 + $0xc8] sm:$0xff]  ;;  %s1729_s7 = scalar_lea.hbm %s1728_s28, 64  ;;  %p1734_p11 = scmp.lt.s32.totalorder %s1728_s28, %s2486_s9 }
  0x7a   : > { %v548_v49 = vld [vmem:[%s2075_s19 + $0x138] sm:$0xff]  ;;  %v537_v55 = vld [vmem:[%s2075_s19 + $0xe0] sm:$0xff]  ;;  %v538_v57 = vld [vmem:[%s2075_s19 + $0xe8] sm:$0xff]  ;;  %p1730_p8 = scmp.ne.s32.totalorder %s1728_s28, %s1729_s7  ;;  %p1735_p12 = scmp.lt.s32.totalorder %s1733_s3, %s1729_s7 }
  0x7b   : > { %702 = vmatpush.bf16.xpose.msra.mxu0 %v661_v26  ;;  %721 = vmatpush.bf16.xpose.msra.mxu1 %v662_v27  ;;  %v656_v53 = vpack.c.bf16 %v548_v49, %v544_v48  ;;  %v535_v58 = vld [vmem:[%s2075_s19 + $0xd0] sm:$0xff]  ;;  %v536_v60 = vld [vmem:[%s2075_s19 + $0xd8] sm:$0xff]  ;;  %v649_v62 = vpack.c.bf16 %v537_v55, %v533_v54  ;;  %v650_v63 = vpack.c.bf16 %v538_v57, %v534_v56  ;;  %v525_v2 = vld [vmem:[%s2075_s19 + $0x80] sm:$0xff] }
  0x7c   : > { %740 = vmatpush.bf16.xpose.msra.mxu2 %v663_v28  ;;  %v539_v59 = vld [vmem:[%s2075_s19 + $0xf0] sm:$0xff]  ;;  %v540_v61 = vld [vmem:[%s2075_s19 + $0xf8] sm:$0xff]  ;;  %v529_v3 = vld [vmem:[%s2075_s19 + $0xa0] sm:$0xff]  ;;  %p1731_p9 = pnand %p1730_p8, %p2032_p2  ;;  %p1736_p13 = por %p1735_p12, %p1734_p11 }
  0x7d   : > { %759 = vmatpush.bf16.xpose.msra.mxu3 %v664_v29  ;;  %v651_v0 = vpack.c.bf16 %v539_v59, %v535_v58  ;;  %v652_v1 = vpack.c.bf16 %v540_v61, %v536_v60  ;;  %v526_v4 = vld [vmem:[%s2075_s19 + $0x88] sm:$0xff]  ;;  %v527_v6 = vld [vmem:[%s2075_s19 + $0x90] sm:$0xff]  ;;  %v528_v8 = vld [vmem:[%s2075_s19 + $0x98] sm:$0xff]  ;;  %v645_v10 = vpack.c.bf16 %v529_v3, %v525_v2 }
  0x7e   : > { %v530_v5 = vld [vmem:[%s2075_s19 + $0xa8] sm:$0xff]  ;;  %v531_v7 = vld [vmem:[%s2075_s19 + $0xb0] sm:$0xff]  ;;  %v532_v9 = vld [vmem:[%s2075_s19 + $0xb8] sm:$0xff]  ;;  %p1732_p10 = pneg %p1731_p9 }
  0x7f   : > { %v646_v11 = vpack.c.bf16 %v530_v5, %v526_v4  ;;  %v647_v12 = vpack.c.bf16 %v531_v7, %v527_v6  ;;  %v648_v13 = vpack.c.bf16 %v532_v9, %v528_v8  ;;  %v517_v14 = vld [vmem:[%s2075_s19 + $0x40] sm:$0xff]  ;;  %v518_v16 = vld [vmem:[%s2075_s19 + $0x48] sm:$0xff]  ;;  %v519_v18 = vld [vmem:[%s2075_s19 + $0x50] sm:$0xff] }
  0x80   : > { %v521_v15 = vld [vmem:[%s2075_s19 + $0x60] sm:$0xff]  ;;  %v522_v17 = vld [vmem:[%s2075_s19 + $0x68] sm:$0xff]  ;;  %v523_v19 = vld [vmem:[%s2075_s19 + $0x70] sm:$0xff]  ;;  %p1737_p0 = pnand %p1736_p13, %p1732_p10 }
  0x81   : > { %v520_v20 = vld [vmem:[%s2075_s19 + $0x58] sm:$0xff]  ;;  %v641_v22 = vpack.c.bf16 %v521_v15, %v517_v14  ;;  %v642_v23 = vpack.c.bf16 %v522_v17, %v518_v16  ;;  %v643_v24 = vpack.c.bf16 %v523_v19, %v519_v18  ;;  %v509_v26 = vld [vmem:[%s2075_s19] sm:$0xff]  ;;  %v510_v28 = vld [vmem:[%s2075_s19 + $0x8] sm:$0xff] }
  0x82   : > { %v524_v21 = vld [vmem:[%s2075_s19 + $0x78] sm:$0xff]  ;;  %v513_v27 = vld [vmem:[%s2075_s19 + $0x20] sm:$0xff]  ;;  %v514_v29 = vld [vmem:[%s2075_s19 + $0x28] sm:$0xff] }
  0x83   : > { %703 = vmatpush.bf16.xpose.msra.mxu0 %v657_v38  ;;  %722 = vmatpush.bf16.xpose.msra.mxu1 %v658_v39  ;;  %v644_v25 = vpack.c.bf16 %v524_v21, %v520_v20  ;;  %v511_v30 = vld [vmem:[%s2075_s19 + $0x10] sm:$0xff]  ;;  %v512_v32 = vld [vmem:[%s2075_s19 + $0x18] sm:$0xff]  ;;  %v629_v34 = vld [vmem:[%s2075_s19 + $0x3c0] sm:$0xff]  ;;  %v637_v37 = vpack.c.bf16 %v513_v27, %v509_v26 }
  0x84   : > { %741 = vmatpush.bf16.xpose.msra.mxu2 %v659_v40  ;;  %v515_v31 = vld [vmem:[%s2075_s19 + $0x30] sm:$0xff]  ;;  %v516_v33 = vld [vmem:[%s2075_s19 + $0x38] sm:$0xff]  ;;  %v633_v35 = vld [vmem:[%s2075_s19 + $0x3e0] sm:$0xff] }
  0x85   : > { %760 = vmatpush.bf16.xpose.msra.mxu3 %v660_v41  ;;  %v630_v36 = vld [vmem:[%s2075_s19 + $0x3c8] sm:$0xff]  ;;  %v631_v39 = vld [vmem:[%s2075_s19 + $0x3d0] sm:$0xff]  ;;  %v638_v41 = vpack.c.bf16 %v514_v29, %v510_v28  ;;  %v639_v42 = vpack.c.bf16 %v515_v31, %v511_v30  ;;  %v632_v43 = vld [vmem:[%s2075_s19 + $0x3d8] sm:$0xff]  ;;  %v640_v45 = vpack.c.bf16 %v516_v33, %v512_v32  ;;  %v697_v46 = vpack.c.bf16 %v633_v35, %v629_v34 }
  0x86   : > { %v634_v38 = vld [vmem:[%s2075_s19 + $0x3e8] sm:$0xff]  ;;  %v635_v40 = vld [vmem:[%s2075_s19 + $0x3f0] sm:$0xff]  ;;  %v636_v44 = vld [vmem:[%s2075_s19 + $0x3f8] sm:$0xff] }
  0x87   : > { %v698_v47 = vpack.c.bf16 %v634_v38, %v630_v36  ;;  %v699_v48 = vpack.c.bf16 %v635_v40, %v631_v39  ;;  %v700_v49 = vpack.c.bf16 %v636_v44, %v632_v43  ;;  %v486_v54 = vld [vmem:[#allocation2 + $0x8] sm:$0xff]  ;;  %v488_v56 = vld [vmem:[#allocation2 + $0x18] sm:$0xff]  ;;  %v621_v58 = vld [vmem:[%s2075_s19 + $0x380] sm:$0xff] }
  0x88   : > { %v490_v55 = vld [vmem:[#allocation2 + $0x28] sm:$0xff]  ;;  %v492_v57 = vld [vmem:[#allocation2 + $0x38] sm:$0xff]  ;;  %v625_v59 = vld [vmem:[%s2075_s19 + $0x3a0] sm:$0xff] }
  0x89   : > { %v622_v60 = vld [vmem:[%s2075_s19 + $0x388] sm:$0xff]  ;;  %v2179_v2 = vpack.c.bf16 %v490_v55, %v486_v54  ;;  %v2181_v3 = vpack.c.bf16 %v492_v57, %v488_v56  ;;  %v624_v4 = vld [vmem:[%s2075_s19 + $0x398] sm:$0xff]  ;;  %v693_v6 = vpack.c.bf16 %v625_v59, %v621_v58  ;;  %v615_v14 = vld [vmem:[%s2075_s19 + $0x350] sm:$0xff] }
  0x8a   : > { %v628_v5 = vld [vmem:[%s2075_s19 + $0x3b8] sm:$0xff]  ;;  %v619_v15 = vld [vmem:[%s2075_s19 + $0x370] sm:$0xff]  ;;  %v494_v26 = vld [vmem:[#allocation2 + $0x48] sm:$0xff] }
  0x8b   : > { %704 = vmatpush.bf16.xpose.msra.mxu0 %v653_v50  ;;  %723 = vmatpush.bf16.xpose.msra.mxu1 %v654_v51  ;;  %v487_v50 = vld [vmem:[#allocation2 + $0x10] sm:$0xff]  ;;  %v485_v51 = vld [vmem:[#allocation2] sm:$0xff]  ;;  %v696_v9 = vpack.c.bf16 %v628_v5, %v624_v4  ;;  %v616_v16 = vld [vmem:[%s2075_s19 + $0x358] sm:$0xff]  ;;  %v691_v20 = vpack.c.bf16 %v619_v15, %v615_v14 }
  0x8c   : > { %742 = vmatpush.bf16.xpose.msra.mxu2 %v655_v52  ;;  %v489_v52 = vld [vmem:[#allocation2 + $0x20] sm:$0xff]  ;;  %v620_v17 = vld [vmem:[%s2075_s19 + $0x378] sm:$0xff]  ;;  %v498_v27 = vld [vmem:[#allocation2 + $0x68] sm:$0xff] }
  0x8d   : > { %761 = vmatpush.bf16.xpose.msra.mxu3 %v656_v53  ;;  %v491_v53 = vld [vmem:[#allocation2 + $0x30] sm:$0xff]  ;;  %v2172_v61 = vpack.c.bf16 %v489_v52, %v485_v51  ;;  %v692_v21 = vpack.c.bf16 %v620_v17, %v616_v16  ;;  %v496_v28 = vld [vmem:[#allocation2 + $0x58] sm:$0xff]  ;;  %v605_v30 = vld [vmem:[%s2075_s19 + $0x300] sm:$0xff]  ;;  %v2207_v38 = vpack.c.bf16 %v498_v27, %v494_v26 }
  0x8e   : > { %v500_v29 = vld [vmem:[#allocation2 + $0x78] sm:$0xff]  ;;  %v609_v31 = vld [vmem:[%s2075_s19 + $0x320] sm:$0xff]  ;;  %v606_v32 = vld [vmem:[%s2075_s19 + $0x308] sm:$0xff] }
  0x8f   : > { %v610_v35 = vld [vmem:[%s2075_s19 + $0x328] sm:$0xff]  ;;  %v607_v36 = vld [vmem:[%s2075_s19 + $0x310] sm:$0xff]  ;;  %v2209_v39 = vpack.c.bf16 %v500_v29, %v496_v28  ;;  %v608_v40 = vld [vmem:[%s2075_s19 + $0x318] sm:$0xff] }
  0x90   : > { %v686_v43 = vpack.c.bf16 %v610_v35, %v606_v32  ;;  %v603_v51 = vld [vmem:[%s2075_s19 + $0x2f0] sm:$0xff]  ;;  %v600_v52 = vld [vmem:[%s2075_s19 + $0x2d8] sm:$0xff]  ;;  %v589_v58 = vld [vmem:[%s2075_s19 + $0x280] sm:$0xff] }
  0x91   : > { %v593_v59 = vld [vmem:[%s2075_s19 + $0x2a0] sm:$0xff]  ;;  %v592_v4 = vld [vmem:[%s2075_s19 + $0x298] sm:$0xff]  ;;  %v583_v14 = vld [vmem:[%s2075_s19 + $0x250] sm:$0xff] }
  0x92   : > { %v596_v5 = vld [vmem:[%s2075_s19 + $0x2b8] sm:$0xff]  ;;  %v587_v15 = vld [vmem:[%s2075_s19 + $0x270] sm:$0xff] }
  0x93   : > { %705 = vmatpush.bf16.xpose.msra.mxu0 %v649_v62  ;;  %724 = vmatpush.bf16.xpose.msra.mxu1 %v650_v63  ;;  %v2174_v62 = vpack.c.bf16 %v491_v53, %v487_v50  ;;  %v626_v63 = vld [vmem:[%s2075_s19 + $0x3a8] sm:$0xff]  ;;  %v599_v50 = vld [vmem:[%s2075_s19 + $0x2d0] sm:$0xff]  ;;  %v604_v53 = vld [vmem:[%s2075_s19 + $0x2f8] sm:$0xff] }
  0x94   : > { %743 = vmatpush.bf16.xpose.msra.mxu2 %v651_v0  ;;  %v623_v0 = vld [vmem:[%s2075_s19 + $0x390] sm:$0xff]  ;;  %v694_v7 = vpack.c.bf16 %v626_v63, %v622_v60  ;;  %v683_v56 = vpack.c.bf16 %v603_v51, %v599_v50  ;;  %v684_v57 = vpack.c.bf16 %v604_v53, %v600_v52  ;;  %v590_v60 = vld [vmem:[%s2075_s19 + $0x288] sm:$0xff]  ;;  %v584_v16 = vld [vmem:[%s2075_s19 + $0x258] sm:$0xff] }
  0x95   : > { %762 = vmatpush.bf16.xpose.msra.mxu3 %v652_v1  ;;  %v627_v1 = vld [vmem:[%s2075_s19 + $0x3b0] sm:$0xff]  ;;  %v594_v63 = vld [vmem:[%s2075_s19 + $0x2a8] sm:$0xff]  ;;  %v588_v17 = vld [vmem:[%s2075_s19 + $0x278] sm:$0xff] }
  0x96   : > { %v695_v8 = vpack.c.bf16 %v627_v1, %v623_v0  ;;  %v591_v0 = vld [vmem:[%s2075_s19 + $0x290] sm:$0xff]  ;;  %v576_v28 = vld [vmem:[%s2075_s19 + $0x218] sm:$0xff] }
  0x97   : > { %v595_v1 = vld [vmem:[%s2075_s19 + $0x2b0] sm:$0xff]  ;;  %v580_v29 = vld [vmem:[%s2075_s19 + $0x238] sm:$0xff] }
  0x98   : > { %v575_v26 = vld [vmem:[%s2075_s19 + $0x210] sm:$0xff]  ;;  %v672_v35 = vpack.c.bf16 %v580_v29, %v576_v28 }
  0x99   : > { %v579_v27 = vld [vmem:[%s2075_s19 + $0x230] sm:$0xff] }
  0x9a   : > { %v671_v32 = vpack.c.bf16 %v579_v27, %v575_v26 }
  0x9b   : > { %706 = vmatpush.bf16.xpose.msra.mxu0 %v645_v10  ;;  %725 = vmatpush.bf16.xpose.msra.mxu1 %v646_v11  ;;  %v613_v10 = vld [vmem:[%s2075_s19 + $0x340] sm:$0xff] }
  0x9c   : > { %744 = vmatpush.bf16.xpose.msra.mxu2 %v647_v12  ;;  %v617_v11 = vld [vmem:[%s2075_s19 + $0x360] sm:$0xff]  ;;  %v614_v12 = vld [vmem:[%s2075_s19 + $0x348] sm:$0xff] }
  0x9d   : > { %763 = vmatpush.bf16.xpose.msra.mxu3 %v648_v13  ;;  %v618_v13 = vld [vmem:[%s2075_s19 + $0x368] sm:$0xff]  ;;  %v689_v18 = vpack.c.bf16 %v617_v11, %v613_v10  ;;  %v581_v10 = vld [vmem:[%s2075_s19 + $0x240] sm:$0xff] }
  0x9e   : > { %v690_v19 = vpack.c.bf16 %v618_v13, %v614_v12  ;;  %v585_v11 = vld [vmem:[%s2075_s19 + $0x260] sm:$0xff]  ;;  %v582_v12 = vld [vmem:[%s2075_s19 + $0x248] sm:$0xff] }
  0x9f   : > { %v586_v13 = vld [vmem:[%s2075_s19 + $0x268] sm:$0xff] }
  0xa3   : > { %707 = vmatpush.bf16.xpose.msra.mxu0 %v641_v22  ;;  %726 = vmatpush.bf16.xpose.msra.mxu1 %v642_v23  ;;  %v495_v22 = vld [vmem:[#allocation2 + $0x50] sm:$0xff]  ;;  %v493_v23 = vld [vmem:[#allocation2 + $0x40] sm:$0xff] }
  0xa4   : > { %745 = vmatpush.bf16.xpose.msra.mxu2 %v643_v24  ;;  %v497_v24 = vld [vmem:[#allocation2 + $0x60] sm:$0xff] }
  0xa5   : > { %764 = vmatpush.bf16.xpose.msra.mxu3 %v644_v25  ;;  %v499_v25 = vld [vmem:[#allocation2 + $0x70] sm:$0xff]  ;;  %v2200_v33 = vpack.c.bf16 %v497_v24, %v493_v23  ;;  %v577_v23 = vld [vmem:[%s2075_s19 + $0x220] sm:$0xff]  ;;  %v574_v24 = vld [vmem:[%s2075_s19 + $0x208] sm:$0xff] }
  0xa6   : > { %v2202_v34 = vpack.c.bf16 %v499_v25, %v495_v22  ;;  %v573_v22 = vld [vmem:[%s2075_s19 + $0x200] sm:$0xff]  ;;  %v578_v25 = vld [vmem:[%s2075_s19 + $0x228] sm:$0xff] }
  0xab   : > { %708 = vmatpush.bf16.xpose.msra.mxu0 %v637_v37  ;;  %727 = vmatpush.bf16.xpose.msra.mxu1 %v638_v41  ;;  %v611_v37 = vld [vmem:[%s2075_s19 + $0x330] sm:$0xff]  ;;  %v612_v41 = vld [vmem:[%s2075_s19 + $0x338] sm:$0xff] }
  0xac   : > { %746 = vmatpush.bf16.xpose.msra.mxu2 %v639_v42  ;;  %v685_v42 = vpack.c.bf16 %v609_v31, %v605_v30  ;;  %v687_v44 = vpack.c.bf16 %v611_v37, %v607_v36  ;;  %v669_v30 = vpack.c.bf16 %v577_v23, %v573_v22  ;;  %v670_v31 = vpack.c.bf16 %v578_v25, %v574_v24 }
  0xad   : > { %765 = vmatpush.bf16.xpose.msra.mxu3 %v640_v45  ;;  %v688_v45 = vpack.c.bf16 %v612_v41, %v608_v40 }
  0xb2   : > { %709 = vmatmul.bf16.vlgmr.msra.gmra.mxu0 %v2172_v61  ;;  %728 = vmatmul.bf16.vlgmr.msra.gmra.mxu1 %v2179_v2 }
  0xb3   : > { %777 = vmatpush.bf16.xpose.msrb.mxu0 %v697_v46  ;;  %796 = vmatpush.bf16.xpose.msrb.mxu1 %v698_v47  ;;  %v597_v46 = vld [vmem:[%s2075_s19 + $0x2c0] sm:$0xff] }
  0xb4   : > { %815 = vmatpush.bf16.xpose.msrb.mxu2 %v699_v48  ;;  %766 = vmatmul.bf16.vlgmr.msra.gmra.mxu3 %v2181_v3  ;;  %v601_v47 = vld [vmem:[%s2075_s19 + $0x2e0] sm:$0xff]  ;;  %v598_v48 = vld [vmem:[%s2075_s19 + $0x2c8] sm:$0xff] }
  0xb5   : > { %834 = vmatpush.bf16.xpose.msrb.mxu3 %v700_v49  ;;  %747 = vmatmul.bf16.vlgmr.msra.gmra.mxu2 %v2174_v62  ;;  %v602_v49 = vld [vmem:[%s2075_s19 + $0x2e8] sm:$0xff]  ;;  %v681_v54 = vpack.c.bf16 %v601_v47, %v597_v46 }
  0xb6   : > { %v682_v55 = vpack.c.bf16 %v602_v49, %v598_v48 }
  0xbb   : > { %778 = vmatpush.bf16.xpose.msrb.mxu0 %v693_v6  ;;  %797 = vmatpush.bf16.xpose.msrb.mxu1 %v694_v7  ;;  %v677_v6 = vpack.c.bf16 %v593_v59, %v589_v58  ;;  %v678_v7 = vpack.c.bf16 %v594_v63, %v590_v60 }
  0xbc   : > { %816 = vmatpush.bf16.xpose.msrb.mxu2 %v695_v8  ;;  %v679_v8 = vpack.c.bf16 %v595_v1, %v591_v0 }
  0xbd   : > { %835 = vmatpush.bf16.xpose.msrb.mxu3 %v696_v9  ;;  %v680_v9 = vpack.c.bf16 %v596_v5, %v592_v4 }
  0xc2   : > { %714 = vmatmul.bf16.gmra.mxu0 %v2200_v33  ;;  %733 = vmatmul.bf16.gmra.mxu1 %v2207_v38 }
  0xc3   : > { %779 = vmatpush.bf16.xpose.msrb.mxu0 %v689_v18  ;;  %798 = vmatpush.bf16.xpose.msrb.mxu1 %v690_v19  ;;  %v673_v18 = vpack.c.bf16 %v585_v11, %v581_v10  ;;  %v674_v19 = vpack.c.bf16 %v586_v13, %v582_v12 }
  0xc4   : > { %817 = vmatpush.bf16.xpose.msrb.mxu2 %v691_v20  ;;  %771 = vmatmul.bf16.gmra.mxu3 %v2209_v39  ;;  %v675_v20 = vpack.c.bf16 %v587_v15, %v583_v14 }
  0xc5   : > { %836 = vmatpush.bf16.xpose.msrb.mxu3 %v692_v21  ;;  %752 = vmatmul.bf16.gmra.mxu2 %v2202_v34  ;;  %v676_v21 = vpack.c.bf16 %v588_v17, %v584_v16 }
  0xcb   : > { %780 = vmatpush.bf16.xpose.msrb.mxu0 %v685_v42  ;;  %799 = vmatpush.bf16.xpose.msrb.mxu1 %v686_v43 }
  0xcc   : > { %818 = vmatpush.bf16.xpose.msrb.mxu2 %v687_v44 }
  0xcd   : > { %837 = vmatpush.bf16.xpose.msrb.mxu3 %v688_v45 }
  0xd3   : > { %781 = vmatpush.bf16.xpose.msrb.mxu0 %v681_v54  ;;  %800 = vmatpush.bf16.xpose.msrb.mxu1 %v682_v55 }
  0xd4   : > { %819 = vmatpush.bf16.xpose.msrb.mxu2 %v683_v56 }
  0xd5   : > { %838 = vmatpush.bf16.xpose.msrb.mxu3 %v684_v57 }
  0xdb   : > { %782 = vmatpush.bf16.xpose.msrb.mxu0 %v677_v6  ;;  %801 = vmatpush.bf16.xpose.msrb.mxu1 %v678_v7 }
  0xdc   : > { %820 = vmatpush.bf16.xpose.msrb.mxu2 %v679_v8 }
  0xdd   : > { %839 = vmatpush.bf16.xpose.msrb.mxu3 %v680_v9 }
  0xe3   : > { %783 = vmatpush.bf16.xpose.msrb.mxu0 %v673_v18  ;;  %802 = vmatpush.bf16.xpose.msrb.mxu1 %v674_v19 }
  0xe4   : > { %821 = vmatpush.bf16.xpose.msrb.mxu2 %v675_v20 }
  0xe5   : > { %840 = vmatpush.bf16.xpose.msrb.mxu3 %v676_v21 }
  0xeb   : > { %784 = vmatpush.bf16.xpose.msrb.mxu0 %v669_v30  ;;  %803 = vmatpush.bf16.xpose.msrb.mxu1 %v670_v31 }
  0xec   : > { %822 = vmatpush.bf16.xpose.msrb.mxu2 %v671_v32 }
  0xed   : > { %841 = vmatpush.bf16.xpose.msrb.mxu3 %v672_v35 }
  0xf2   : > { %785 = vmatmul.bf16.vlgmr.msrb.gmra.mxu0 %v2172_v61  ;;  %804 = vmatmul.bf16.vlgmr.msrb.gmra.mxu1 %v2179_v2 }
  0xf3   : > { %823 = vmatmul.bf16.vlgmr.msrb.gmra.mxu2 %v2174_v62 }
  0xf4   : > { %842 = vmatmul.bf16.vlgmr.msrb.gmra.mxu3 %v2181_v3 }
 0x102   : > { %790 = vmatmul.bf16.gmra.mxu0 %v2200_v33  ;;  %809 = vmatmul.bf16.gmra.mxu1 %v2207_v38 }
 0x103   : > { %828 = vmatmul.bf16.gmra.mxu2 %v2202_v34 }
 0x104   : > { %847 = vmatmul.bf16.gmra.mxu3 %v2209_v39 }
 0x12f   : > { %v710_v36 = vpop.f32.mrf.mxu0  ;;  %v729_v37 = vpop.f32.mrf.mxu1 }
 0x130   : > { %v730_v3 = vadd.f32 %v729_v37, %v710_v36 }
 0x137   : > { %v767_v41 = vpop.f32.mrf.mxu3  ;;  %v712_v42 = vpop.f32.mrf.mxu0 }
 0x138   : > { %v748_v40 = vpop.f32.mrf.mxu2  ;;  %v731_v61 = vpop.f32.mrf.mxu1 }
 0x139   : > { %v732_v46 = vadd.f32 %v731_v61, %v712_v42  ;;  %v749_v47 = vadd.f32 %v748_v40, %v730_v3 }
 0x13b   : > { %v2257_v39 = vadd.f32 %v767_v41, %v749_v47 }
 0x13d   : > { %v871_v54 = vmul.f32 %v2257_v39, %v2257_v39 }
 0x13f   : > { %v769_v2 = vpop.f32.mrf.mxu3  ;;  %v715_v44 = vpop.f32.mrf.mxu0 }
 0x140   : > { %v750_v43 = vpop.f32.mrf.mxu2  ;;  %v734_v62 = vpop.f32.mrf.mxu1 }
 0x141   : > { %v751_v38 = vadd.f32 %v750_v43, %v732_v46  ;;  %v735_v48 = vadd.f32 %v734_v62, %v715_v44 }
 0x143   : > { %v2259_v50 = vadd.f32 %v769_v2, %v751_v38 }
 0x145   : > { %v873_v55 = vmul.f32 %v2259_v50, %v2259_v50  ;;  %v853_v58 = vadd.f32 %v2259_v50, %v2257_v39 }
 0x147   : > { %v772_v33 = vpop.f32.mrf.mxu3  ;;  %v717_v34 = vpop.f32.mrf.mxu0  ;;  %v879_v60 = vadd.f32 %v873_v55, %v871_v54  ;;  %v1021_v55 = vld [vmem:[%s2089_s16 + $0xe8] sm:$0xff] }
 0x148   : > { %v753_v45 = vpop.f32.mrf.mxu2  ;;  %v736_v49 = vpop.f32.mrf.mxu1 }
 0x149   : > { %v754_v51 = vadd.f32 %v753_v45, %v735_v48  ;;  %v737_v52 = vadd.f32 %v736_v49, %v717_v34 }
 0x14b   : > { %v2265_v56 = vadd.f32 %v772_v33, %v754_v51 }
 0x14d   : > { %v875_v63 = vmul.f32 %v2265_v56, %v2265_v56  ;;  %v854_v1 = vadd.f32 %v853_v58, %v2265_v56  ;;  %v1053_v58 = vld [vmem:[%s2089_s16 + $0x1e8] sm:$0xff] }
 0x14f   : > { %v774_v59 = vpop.f32.mrf.mxu3  ;;  %v880_v5 = vadd.f32 %v879_v60, %v875_v63 }
 0x150   : > { %v755_v53 = vpop.f32.mrf.mxu2 }
 0x151   : > { %v756_v57 = vadd.f32 %v755_v53, %v737_v52 }
 0x153   : > { %v2271_v0 = vadd.f32 %v774_v59, %v756_v57  ;;  %v1023_v57 = vld [vmem:[%s2089_s16 + $0xf8] sm:$0xff] }
 0x155   : > { %v877_v6 = vmul.f32 %v2271_v0, %v2271_v0  ;;  %v855_v8 = vadd.f32 %v854_v1, %v2271_v0  ;;  %v1071_v1 = vpack.c.bf16 %v1023_v57, %v1021_v55 }
 0x157   : > { %v881_v9 = vadd.f32 %v880_v5, %v877_v6  ;;  %v856_v10 = vrot.slane %v855_v8, 4  ;;  %v1020_v5 = vld [vmem:[%s2089_s16 + $0xe0] sm:$0xff]  ;;  %v1022_v6 = vld [vmem:[%s2089_s16 + $0xf0] sm:$0xff]  ;;  %1126 = vmatpush.bf16.msra.mxu2 %v1071_v1 }
 0x159   : > { %v882_v14 = vrot.slane %v881_v9, 4  ;;  %v857_v16 = vadd.f32 %v856_v10, %v855_v8  ;;  %v1070_v8 = vpack.c.bf16 %v1022_v6, %v1020_v5  ;;  %v1054_v10 = vld [vmem:[%s2089_s16 + $0x1f0] sm:$0xff]  ;;  %v1040_v5 = vld [vmem:[%s2089_s16 + $0x180] sm:$0xff] }
 0x15a   : > { %v1042_v6 = vld [vmem:[%s2089_s16 + $0x190] sm:$0xff] }
 0x15b   : > { %v883_v17 = vadd.f32 %v882_v14, %v881_v9  ;;  %v858_v18 = vrot.slane %v857_v16, 2  ;;  %v1052_v9 = vld [vmem:[%s2089_s16 + $0x1e0] sm:$0xff]  ;;  %1088 = vmatpush.bf16.msra.mxu0 %v1070_v8 }
 0x15c   : > { %v1086_v14 = vpack.c.bf16 %v1054_v10, %v1052_v9  ;;  %v1080_v9 = vpack.c.bf16 %v1042_v6, %v1040_v5  ;;  %v1005_v10 = vld [vmem:[%s2089_s16 + $0x68] sm:$0xff]  ;;  %v994_v5 = vld [vmem:[%s2089_s16 + $0x10] sm:$0xff]  ;;  %v1024_v6 = vld [vmem:[%s2089_s16 + $0x100] sm:$0xff] }
 0x15d   : > { %v884_v21 = vrot.slane %v883_v17, 2  ;;  %v859_v24 = vadd.f32 %v858_v18, %v857_v16  ;;  %v1019_v16 = vld [vmem:[%s2089_s16 + $0xd8] sm:$0xff] }
 0x15e   : > { %1107 = vmatpush.bf16.msra.mxu1 %v1086_v14 }
 0x15f   : > { %v885_v28 = vadd.f32 %v884_v21, %v883_v17  ;;  %v860_v29 = vrot.slane %v859_v24, 1  ;;  %v1049_v17 = vld [vmem:[%s2089_s16 + $0x1c8] sm:$0xff]  ;;  %v1051_v21 = vld [vmem:[%s2089_s16 + $0x1d8] sm:$0xff] }
 0x161   : > { %v886_v37 = vrot.slane %v885_v28, 1  ;;  %v861_v40 = vadd.f32 %v860_v29, %v859_v24  ;;  %v1085_v24 = vpack.c.bf16 %v1051_v21, %v1049_v17  ;;  %v1004_v17 = vld [vmem:[%s2089_s16 + $0x60] sm:$0xff] }
 0x162   : > { %v1036_v21 = vld [vmem:[%s2089_s16 + $0x160] sm:$0xff] }
 0x163   : > { %v887_v44 = vadd.f32 %v886_v37, %v885_v28  ;;  %v2283_v62 = vmul.f32 0.03125, %v861_v40 }
 0x165   : > { %v899_v34 = vmul.f32 0.03125, %v887_v44  ;;  %v901_v51 = vmul.f32 %v2283_v62, %v2283_v62  ;;  %v1012_v44 = vld [vmem:[%s2089_s16 + $0xa0] sm:$0xff] }
 0x16f   : > { %v786_v4 = vpop.f32.mrf.mxu0  ;;  %v805_v7 = vpop.f32.mrf.mxu1 }
 0x170   : > { %v806_v25 = vadd.f32 %v805_v7, %v786_v4  ;;  %v1055_v4 = vld [vmem:[%s2089_s16 + $0x1f8] sm:$0xff] }
 0x171   : > { %v1087_v7 = vpack.c.bf16 %v1055_v4, %v1053_v58 }
 0x173   : > { %1145 = vmatpush.bf16.msra.mxu3 %v1087_v7 }
 0x176   : > { %v824_v11 = vpop.f32.mrf.mxu2 }
 0x177   : > { %v843_v12 = vpop.f32.mrf.mxu3  ;;  %v788_v13 = vpop.f32.mrf.mxu0  ;;  %v825_v32 = vadd.f32 %v824_v11, %v806_v25  ;;  %v903_v11 = vsub.f32 %v899_v34, %v901_v51  ;;  %1146 = vmatpush.bf16.msra.mxu3 %v1085_v24  ;;  %v1009_v51 = vld [vmem:[%s2089_s16 + $0x88] sm:$0xff] }
 0x178   : > { %v807_v15 = vpop.f32.mrf.mxu1 }
 0x179   : > { %v808_v26 = vadd.f32 %v807_v15, %v788_v13  ;;  %v2279_v43 = vadd.f32 %v843_v12, %v825_v32  ;;  %v1017_v15 = vld [vmem:[%s2089_s16 + $0xc8] sm:$0xff]  ;;  %v905_v28 = vmax.f32 %v903_v11, 0.0  ;;  %v1007_v11 = vld [vmem:[%s2089_s16 + $0x78] sm:$0xff] }
 0x17a   : > { %v1013_v32 = vld [vmem:[%s2089_s16 + $0xa8] sm:$0xff] }
 0x17b   : > { %v872_v33 = vmul.f32 %v2279_v43, %v2279_v43 }
 0x17e   : > { %v826_v19 = vpop.f32.mrf.mxu2 }
 0x17f   : > { %v845_v20 = vpop.f32.mrf.mxu3  ;;  %v791_v22 = vpop.f32.mrf.mxu0  ;;  %v827_v30 = vadd.f32 %v826_v19, %v808_v26  ;;  %v1048_v26 = vld [vmem:[%s2089_s16 + $0x1c0] sm:$0xff] }
 0x180   : > { %v810_v23 = vpop.f32.mrf.mxu1 }
 0x181   : > { %v811_v27 = vadd.f32 %v810_v23, %v791_v22  ;;  %v2277_v41 = vadd.f32 %v845_v20, %v827_v30  ;;  %v1069_v20 = vpack.c.bf16 %v1019_v16, %v1017_v15  ;;  %v1016_v22 = vld [vmem:[%s2089_s16 + $0xc0] sm:$0xff]  ;;  %v1018_v23 = vld [vmem:[%s2089_s16 + $0xd0] sm:$0xff]  ;;  %v1063_v15 = vpack.c.bf16 %v1007_v11, %v1005_v10  ;;  %v1039_v16 = vld [vmem:[%s2089_s16 + $0x178] sm:$0xff] }
 0x182   : > { %v1068_v25 = vpack.c.bf16 %v1018_v23, %v1016_v22  ;;  %v1038_v22 = vld [vmem:[%s2089_s16 + $0x170] sm:$0xff] }
 0x183   : > { %v874_v45 = vmul.f32 %v2277_v41, %v2277_v41  ;;  %v862_v47 = vadd.f32 %v2277_v41, %v2279_v43  ;;  %1127 = vmatpush.bf16.msra.mxu2 %v1069_v20  ;;  %v1078_v24 = vpack.c.bf16 %v1038_v22, %v1036_v21  ;;  %v1026_v11 = vld [vmem:[%s2089_s16 + $0x110] sm:$0xff] }
 0x184   : > { %1089 = vmatpush.bf16.msra.mxu0 %v1068_v25  ;;  %v1001_v25 = vld [vmem:[%s2089_s16 + $0x48] sm:$0xff] }
 0x185   : > { %v888_v52 = vadd.f32 %v874_v45, %v872_v33  ;;  %v1014_v45 = vld [vmem:[%s2089_s16 + $0xb0] sm:$0xff]  ;;  %v1044_v33 = vld [vmem:[%s2089_s16 + $0x1a0] sm:$0xff] }
 0x186   : > { %v829_v31 = vpop.f32.mrf.mxu2 }
 0x187   : > { %v830_v35 = vadd.f32 %v829_v31, %v811_v27  ;;  %v848_v36 = vpop.f32.mrf.mxu3  ;;  %v793_v42 = vpop.f32.mrf.mxu0  ;;  %v1050_v27 = vld [vmem:[%s2089_s16 + $0x1d0] sm:$0xff] }
 0x188   : > { %v812_v61 = vpop.f32.mrf.mxu1  ;;  %v1084_v31 = vpack.c.bf16 %v1050_v27, %v1048_v26  ;;  %v1003_v26 = vld [vmem:[%s2089_s16 + $0x58] sm:$0xff]  ;;  %v1033_v27 = vld [vmem:[%s2089_s16 + $0x148] sm:$0xff] }
 0x189   : > { %v2281_v2 = vadd.f32 %v848_v36, %v830_v35  ;;  %v813_v3 = vadd.f32 %v812_v61, %v793_v42  ;;  %v1015_v35 = vld [vmem:[%s2089_s16 + $0xb8] sm:$0xff]  ;;  %v1045_v36 = vld [vmem:[%s2089_s16 + $0x1a8] sm:$0xff] }
 0x18a   : > { %1108 = vmatpush.bf16.msra.mxu1 %v1084_v31  ;;  %v1067_v42 = vpack.c.bf16 %v1015_v35, %v1013_v32  ;;  %v1047_v61 = vld [vmem:[%s2089_s16 + $0x1b8] sm:$0xff]  ;;  %v1000_v32 = vld [vmem:[%s2089_s16 + $0x40] sm:$0xff]  ;;  %v1002_v35 = vld [vmem:[%s2089_s16 + $0x50] sm:$0xff] }
 0x18b   : > { %v876_v38 = vmul.f32 %v2281_v2, %v2281_v2  ;;  %v863_v53 = vadd.f32 %v862_v47, %v2281_v2  ;;  %v1046_v47 = vld [vmem:[%s2089_s16 + $0x1b0] sm:$0xff]  ;;  %v1035_v31 = vld [vmem:[%s2089_s16 + $0x158] sm:$0xff] }
 0x18c   : > { %1128 = vmatpush.bf16.msra.mxu2 %v1067_v42  ;;  %v1034_v42 = vld [vmem:[%s2089_s16 + $0x150] sm:$0xff] }
 0x18d   : > { %v889_v59 = vadd.f32 %v888_v52, %v876_v38  ;;  %v2325_v38 = vadd.f32 1e-05, %v905_v28  ;;  %v1011_v52 = vld [vmem:[%s2089_s16 + $0x98] sm:$0xff] }
 0x18e   : > { %v831_v46 = vpop.f32.mrf.mxu2  ;;  %v1065_v58 = vpack.c.bf16 %v1011_v52, %v1009_v51 }
 0x18f   : > { %v832_v48 = vadd.f32 %v831_v46, %v813_v3  ;;  %v850_v49 = vpop.f32.mrf.mxu3  ;;  %v1083_v3 = vpack.c.bf16 %v1047_v61, %v1045_v36  ;;  %v1066_v46 = vpack.c.bf16 %v1014_v45, %v1012_v44  ;;  %1529 = vrsqrt.f32 %v2325_v38  ;;  %v997_v45 = vld [vmem:[%s2089_s16 + $0x28] sm:$0xff] }
 0x190   : > { %1129 = vmatpush.bf16.msra.mxu2 %v1065_v58  ;;  %v1077_v36 = vpack.c.bf16 %v1035_v31, %v1033_v27  ;;  %vm916_vm5 = vweird.f32 %v2325_v38 }
 0x191   : > { %v2296_v54 = vadd.f32 %v850_v49, %v832_v48  ;;  %v1082_v49 = vpack.c.bf16 %v1046_v47, %v1044_v33  ;;  %1147 = vmatpush.bf16.msra.mxu3 %v1083_v3  ;;  %1090 = vmatpush.bf16.msra.mxu0 %v1066_v46  ;;  %v999_v3 = vld [vmem:[%s2089_s16 + $0x38] sm:$0xff]  ;;  %v1029_v46 = vld [vmem:[%s2089_s16 + $0x128] sm:$0xff] }
 0x192   : > { %v1059_v47 = vpack.c.bf16 %v999_v3, %v997_v45 }
 0x193   : > { %v864_v60 = vadd.f32 %v863_v53, %v2296_v54  ;;  %v878_v63 = vmul.f32 %v2296_v54, %v2296_v54  ;;  %v1041_v53 = vld [vmem:[%s2089_s16 + $0x188] sm:$0xff]  ;;  %1109 = vmatpush.bf16.msra.mxu1 %v1082_v49  ;;  %v998_v49 = vld [vmem:[%s2089_s16 + $0x30] sm:$0xff] }
 0x194   : > { %1130 = vmatpush.bf16.msra.mxu2 %v1063_v15 }
 0x195   : > { %v865_v12 = vrot.slane %v864_v60, 4  ;;  %v890_v13 = vadd.f32 %v889_v59, %v878_v63  ;;  %v1043_v59 = vld [vmem:[%s2089_s16 + $0x198] sm:$0xff]  ;;  %v1010_v63 = vld [vmem:[%s2089_s16 + $0x90] sm:$0xff]  ;;  %v2351_v28 = vpop.eup %1529 }
 0x196   : > { %v1081_v1 = vpack.c.bf16 %v1043_v59, %v1041_v53  ;;  %v911_v33 = vmul.f32 %v2351_v28, %v2325_v38  ;;  %v1028_v53 = vld [vmem:[%s2089_s16 + $0x120] sm:$0xff]  ;;  %v995_v59 = vld [vmem:[%s2089_s16 + $0x18] sm:$0xff]  ;;  %vm917_vm2 = vweird.f32 %v2351_v28 }
 0x197   : > { %v866_v18 = vadd.f32 %v865_v12, %v864_v60  ;;  %v891_v19 = vrot.slane %v890_v13, 4  ;;  %v1008_v60 = vld [vmem:[%s2089_s16 + $0x80] sm:$0xff]  ;;  %v1037_v12 = vld [vmem:[%s2089_s16 + $0x168] sm:$0xff]  ;;  %1110 = vmatpush.bf16.msra.mxu1 %v1080_v9  ;;  %vm918_vm7 = vmor %vm916_vm5, %vm917_vm2 }
 0x198   : > { %v1064_v4 = vpack.c.bf16 %v1010_v63, %v1008_v60  ;;  %1148 = vmatpush.bf16.msra.mxu3 %v1081_v1  ;;  %v1025_v60 = vld [vmem:[%s2089_s16 + $0x108] sm:$0xff]  ;;  %v1027_v63 = vld [vmem:[%s2089_s16 + $0x118] sm:$0xff] }
 0x199   : > { %v867_v29 = vrot.slane %v866_v18, 2  ;;  %v892_v30 = vadd.f32 %v891_v19, %v890_v13  ;;  %v1079_v19 = vpack.c.bf16 %v1039_v16, %v1037_v12  ;;  %v1073_v9 = vpack.c.bf16 %v1027_v63, %v1025_v60 }
 0x19a   : > { %1091 = vmatpush.bf16.msra.mxu0 %v1064_v4  ;;  %v992_v4 = vld [vmem:[%s2089_s16] sm:$0xff]  ;;  %v1072_v12 = vpack.c.bf16 %v1026_v11, %v1024_v6 }
 0x19b   : > { %v868_v37 = vadd.f32 %v867_v29, %v866_v18  ;;  %v893_v40 = vrot.slane %v892_v30, 2  ;;  %v1006_v18 = vld [vmem:[%s2089_s16 + $0x70] sm:$0xff]  ;;  %1111 = vmatpush.bf16.msra.mxu1 %v1078_v24  ;;  %v1056_v10 = vpack.c.bf16 %v994_v5, %v992_v4  ;;  %v980_v4 = vld [vmem:[#allocation13] sm:$0xff] }
 0x19c   : > { %v1062_v20 = vpack.c.bf16 %v1006_v18, %v1004_v17  ;;  %1149 = vmatpush.bf16.msra.mxu3 %v1079_v19 }
 0x19d   : > { %v869_v48 = vrot.slane %v868_v37, 1  ;;  %v894_v34 = vadd.f32 %v893_v40, %v892_v30  ;;  %v1061_v30 = vpack.c.bf16 %v1003_v26, %v1001_v25  ;;  %v1032_v40 = vld [vmem:[%s2089_s16 + $0x140] sm:$0xff] }
 0x19e   : > { %1092 = vmatpush.bf16.msra.mxu0 %v1062_v20  ;;  %v1076_v44 = vpack.c.bf16 %v1034_v42, %v1032_v40 }
 0x19f   : > { %v870_v55 = vadd.f32 %v869_v48, %v868_v37  ;;  %v895_v57 = vrot.slane %v894_v34, 1  ;;  %v1060_v37 = vpack.c.bf16 %v1002_v35, %v1000_v32  ;;  %1131 = vmatpush.bf16.msra.mxu2 %v1061_v30  ;;  %v1031_v48 = vld [vmem:[%s2089_s16 + $0x138] sm:$0xff] }
 0x1a0   : > { %1150 = vmatpush.bf16.msra.mxu3 %v1077_v36  ;;  %1112 = vmatpush.bf16.msra.mxu1 %v1076_v44  ;;  %v1075_v51 = vpack.c.bf16 %v1031_v48, %v1029_v46  ;;  %v937_v32 = vld [vmem:[%s2083_s6] sm:$0x3] }
 0x1a1   : > { %v896_v7 = vadd.f32 %v895_v57, %v894_v34  ;;  %v2336_v8 = vmul.f32 0.03125, %v870_v55  ;;  %v996_v34 = vld [vmem:[%s2089_s16 + $0x20] sm:$0xff]  ;;  %v1030_v55 = vld [vmem:[%s2089_s16 + $0x130] sm:$0xff]  ;;  %v993_v57 = vld [vmem:[%s2089_s16 + $0x8] sm:$0xff] }
 0x1a2   : > { %1093 = vmatpush.bf16.msra.mxu0 %v1060_v37  ;;  %v1058_v52 = vpack.c.bf16 %v998_v49, %v996_v34  ;;  %v1074_v58 = vpack.c.bf16 %v1030_v55, %v1028_v53  ;;  %v1057_v1 = vpack.c.bf16 %v995_v59, %v993_v57 }
 0x1a3   : > { %v900_v13 = vmul.f32 0.03125, %v896_v7  ;;  %v902_v14 = vmul.f32 %v2336_v8, %v2336_v8  ;;  %1132 = vmatpush.bf16.msra.mxu2 %v1059_v47  ;;  %v912_v7 = vmul.f32 %v2351_v28, %v911_v33 }
 0x1a4   : > { %1151 = vmatpush.bf16.msra.mxu3 %v1075_v51  ;;  %1113 = vmatpush.bf16.msra.mxu1 %v1074_v58 }
 0x1a5   : > { %v904_v23 = vsub.f32 %v900_v13, %v902_v14  ;;  %v913_v14 = vmul.f32 0.5, %v912_v7 }
 0x1a6   : > { %1094 = vmatpush.bf16.msra.mxu0 %v1058_v52 }
 0x1a7   : > { %v906_v29 = vmax.f32 %v904_v23, 0.0  ;;  %1133 = vmatpush.bf16.msra.mxu2 %v1057_v1  ;;  %v914_v17 = vsub.f32 1.5, %v913_v14  ;;  %v907_v23 = vld [vmem:[%s2081_s15] sm:$0x3] }
 0x1a8   : > { %1152 = vmatpush.bf16.msra.mxu3 %v1073_v9  ;;  %1114 = vmatpush.bf16.msra.mxu1 %v1072_v12  ;;  %v982_v12 = vld [vmem:[#allocation13 + $0x10] sm:$0xff] }
 0x1a9   : > { %v909_v61 = vadd.f32 1e-05, %v906_v29  ;;  %v915_v20 = vmul.f32 %v2351_v28, %v914_v17 }
 0x1aa   : > { %1095 = vmatpush.bf16.msra.mxu0 %v1056_v10  ;;  %v981_v10 = vld [vmem:[#allocation13 + $0x8] sm:$0xff] }
 0x1ab   : > { %1531 = vrsqrt.f32 %v909_v61  ;;  %vm926_vm3 = vweird.f32 %v909_v61  ;;  %v919_v25 = vsel %vm918_vm7, %v2351_v28, %v915_v20 }
 0x1b1   : > { %v1532_v13 = vpop.eup %1531 }
 0x1b2   : > { %v921_v15 = vmul.f32 %v1532_v13, %v909_v61  ;;  %vm927_vm1 = vweird.f32 %v1532_v13 }
 0x1b3   : > { %vm928_vm4 = vmor %vm926_vm3, %vm927_vm1 }
 0x1b4   : > { %v922_v16 = vmul.f32 %v1532_v13, %v921_v15 }
 0x1b6   : > { %v923_v18 = vmul.f32 0.5, %v922_v16 }
 0x1b8   : > { %v924_v19 = vsub.f32 1.5, %v923_v18  ;;  %v983_v18 = vld [vmem:[#allocation13 + $0x18] sm:$0xff] }
 0x1ba   : > { %v925_v21 = vmul.f32 %v1532_v13, %v924_v19 }
 0x1bc   : > { %v929_v22 = vsel %vm928_vm4, %v1532_v13, %v925_v21 }
 0x1bd   : > { %v932_v24 = vrot.slane %v929_v22, 7  ;;  %v984_v22 = vld [vmem:[#allocation13 + $0x20] sm:$0xff] }
 0x1bf   : > { %v934_v26 = vsel %vm933_vm6, %v919_v25, %v932_v24 }
 0x1c0   : > { %v936_v27 = vmul.f32 %v934_v26, %v907_v23 }
 0x1c2   : > { %v939_v29 = vperm.slane %v936_v27, 0  ;;  %v940_v30 = vperm.slane %v936_v27, 1 }
 0x1c4   : > { %v944_v31 = vmul.f32 %v940_v30, %v2336_v8  ;;  %v943_v35 = vmul.f32 %v939_v29, %v2283_v62  ;;  %v951_v38 = vmul.f32 %v939_v29, %v2257_v39  ;;  %v953_v42 = vmul.f32 %v939_v29, %v2259_v50 }
 0x1c5   : > { %v952_v44 = vmul.f32 %v940_v30, %v2279_v43  ;;  %v954_v28 = vmul.f32 %v940_v30, %v2277_v41  ;;  %v958_v3 = vmul.f32 %v940_v30, %v2296_v54  ;;  %v956_v8 = vmul.f32 %v940_v30, %v2281_v2 }
 0x1c6   : > { %v947_v36 = vrot.slane %v944_v31, 7  ;;  %v955_v2 = vmul.f32 %v939_v29, %v2265_v56  ;;  %v957_v54 = vmul.f32 %v939_v29, %v2271_v0  ;;  %v985_v29 = vld [vmem:[#allocation13 + $0x28] sm:$0xff] }
 0x1c8   : > { %v948_v37 = vsel %vm933_vm6, %v943_v35, %v947_v36  ;;  %v986_v35 = vld [vmem:[#allocation13 + $0x30] sm:$0xff] }
 0x1c9   : > { %v950_v40 = vsub.f32 %v937_v32, %v948_v37 }
 0x1cb   : > { %v960_v61 = vperm.slane %v950_v40, 0  ;;  %v961_v45 = vperm.slane %v950_v40, 1 }
 0x1cd   : > { %v964_v46 = vadd.f32 %v960_v61, %v951_v38  ;;  %v966_v33 = vadd.f32 %v960_v61, %v953_v42  ;;  %v965_v62 = vadd.f32 %v961_v45, %v952_v44  ;;  %v967_v47 = vadd.f32 %v961_v45, %v954_v28 }
 0x1ce   : > { %v969_v48 = vadd.f32 %v961_v45, %v956_v8  ;;  %v971_v34 = vadd.f32 %v961_v45, %v958_v3  ;;  %v968_v57 = vadd.f32 %v960_v61, %v955_v2  ;;  %v970_v58 = vadd.f32 %v960_v61, %v957_v54  ;;  %v987_v61 = vld [vmem:[#allocation13 + $0x38] sm:$0xff] }
 0x1cf   : > { %v972_v49 = vmax.f32 %v964_v46, 0.0  ;;  %v974_v39 = vmax.f32 %v966_v33, 0.0  ;;  %v973_v51 = vmax.f32 %v965_v62, 0.0  ;;  %v975_v50 = vmax.f32 %v967_v47, 0.0 }
 0x1d0   : > { %v977_v52 = vmax.f32 %v969_v48, 0.0  ;;  %v979_v53 = vmax.f32 %v971_v34, 0.0  ;;  %v976_v59 = vmax.f32 %v968_v57, 0.0  ;;  %v978_v60 = vmax.f32 %v970_v58, 0.0 }
 0x1d1   : > { %v988_v43 = vpack.c.bf16 %v974_v39, %v972_v49  ;;  %v989_v55 = vpack.c.bf16 %v975_v50, %v973_v51 }
 0x1d2   : > { %v991_v41 = vpack.c.bf16 %v979_v53, %v977_v52  ;;  %v990_v63 = vpack.c.bf16 %v978_v60, %v976_v59 }
 0x1d3   : > { %1096 = vmatmul.bf16.vlgmr.msra.gmra.mxu0 %v988_v43  ;;  %1115 = vmatmul.bf16.vlgmr.msra.gmra.mxu1 %v989_v55 }
 0x1d4   : > { %1134 = vmatmul.bf16.vlgmr.msra.gmra.mxu2 %v988_v43  ;;  %1153 = vmatmul.bf16.vlgmr.msra.gmra.mxu3 %v989_v55 }
 0x1e3   : > { %1101 = vmatmul.bf16.gmra.mxu0 %v990_v63  ;;  %1120 = vmatmul.bf16.gmra.mxu1 %v991_v41 }
 0x1e4   : > { %1139 = vmatmul.bf16.gmra.mxu2 %v990_v63  ;;  %1158 = vmatmul.bf16.gmra.mxu3 %v991_v41 }
 0x250   : > { %v1097_v1 = vpop.f32.mrf.mxu0  ;;  %v1116_v5 = vpop.f32.mrf.mxu1 }
 0x251   : > { %v1117_v6 = vadd.f32 %v1116_v5, %v1097_v1 }
 0x253   : > { %v1164_v7 = vadd.f32 %v1117_v6, %v980_v4 }
 0x255   : > { %1172 = vst [vmem:[#allocation13] sm:$0xff] %v1164_v7 }
 0x257   : > { %v1135_v9 = vpop.f32.mrf.mxu2  ;;  %v1154_v56 = vpop.f32.mrf.mxu3 }
 0x258   : > { %v1155_v11 = vadd.f32 %v1154_v56, %v1135_v9  ;;  %v1099_v0 = vpop.f32.mrf.mxu0  ;;  %v1118_v13 = vpop.f32.mrf.mxu1 }
 0x259   : > { %v1119_v14 = vadd.f32 %v1118_v13, %v1099_v0 }
 0x25a   : > { %v1165_v15 = vadd.f32 %v1155_v11, %v981_v10 }
 0x25b   : > { %v1166_v16 = vadd.f32 %v1119_v14, %v982_v12 }
 0x25c   : > { %1173 = vst [vmem:[#allocation13 + $0x8] sm:$0xff] %v1165_v15 }
 0x25d   : > { %1174 = vst [vmem:[#allocation13 + $0x10] sm:$0xff] %v1166_v16 }
 0x25f   : > { %v1137_v17 = vpop.f32.mrf.mxu2  ;;  %v1156_v19 = vpop.f32.mrf.mxu3 }
 0x260   : > { %v1157_v20 = vadd.f32 %v1156_v19, %v1137_v17  ;;  %v1102_v21 = vpop.f32.mrf.mxu0  ;;  %v1121_v23 = vpop.f32.mrf.mxu1 }
 0x261   : > { %v1122_v24 = vadd.f32 %v1121_v23, %v1102_v21 }
 0x262   : > { %v1167_v25 = vadd.f32 %v1157_v20, %v983_v18 }
 0x263   : > { %v1168_v26 = vadd.f32 %v1122_v24, %v984_v22 }
 0x264   : > { %1175 = vst [vmem:[#allocation13 + $0x18] sm:$0xff] %v1167_v25 }
 0x265   : > { %1176 = vst [vmem:[#allocation13 + $0x20] sm:$0xff] %v1168_v26 }
 0x267   : > { %v1140_v27 = vpop.f32.mrf.mxu2  ;;  %v1159_v30 = vpop.f32.mrf.mxu3 }
 0x268   : > { %v1160_v31 = vadd.f32 %v1159_v30, %v1140_v27  ;;  %v1104_v32 = vpop.f32.mrf.mxu0  ;;  %v1123_v36 = vpop.f32.mrf.mxu1 }
 0x269   : > { %v1124_v37 = vadd.f32 %v1123_v36, %v1104_v32 }
 0x26a   : > { %v1169_v40 = vadd.f32 %v1160_v31, %v985_v29 }
 0x26b   : > { %v1170_v38 = vadd.f32 %v1124_v37, %v986_v35 }
 0x26c   : > { %1177 = vst [vmem:[#allocation13 + $0x28] sm:$0xff] %v1169_v40 }
 0x26d   : > { %1178 = vst [vmem:[#allocation13 + $0x30] sm:$0xff] %v1170_v38 }
 0x26f   : > { %v1142_v42 = vpop.f32.mrf.mxu2  ;;  %v1161_v44 = vpop.f32.mrf.mxu3 }
 0x270   : > { %v1162_v28 = vadd.f32 %v1161_v44, %v1142_v42 }
 0x272   : > { %v1171_v45 = vadd.f32 %v1162_v28, %v987_v61 }
 0x274   : > { %1179 = vst [vmem:[#allocation13 + $0x38] sm:$0xff] %v1171_v45 }
 0x275   : > { %1740 = shalt.err (!%p1737_p0)
}
 0x276   : > { %s1848_s5 = smov 256   ;;  %s1849_s15 = smov 16  }
 0x277   : > { %1413 = dma.vmem_to_hbm [thread:$0]  (%p2032_p2), %s1189_s13, 1024, %s1191_s20, [#allocation4], %s1848_s5, %s1848_s5, %s1849_s15  }
 0x278   : > { %1798 = dma.done.wait (%p2032_p2), [#allocation4], 1024  }
 0x279   : > { %1800 = vsyncadd (%p2032_p2), [#allocation4], 4294966272 }
 0x27a PF: > { %s25_s30 = sadd.s32 1, %s1839_s30   ;;  %s2487_s8 = sld [smem:[#allocation27_spill]] }
 0x27b   : > { %p22_p1 = scmp.ge.s32.totalorder %s25_s30, 6   ;;  %s2488_s6 = sld [smem:[#allocation19_spill]] }
 0x27c   : > { %s2489_s25 = sld [smem:[#allocation26_spill]]  ;;  %s2494_s21 = smov %s1807_s22 }
 0x27d   : > { %s2490_s26 = sld [smem:[#allocation22_spill]]  ;;  %s2496_s23 = smov %s1815_s24 }
 0x27e   : > { %s2491_s27 = sld [smem:[#allocation23_spill]]  ;;  %24 = sbr.rel (!%p22_p1) target bundleno = 18 (0x12), region = 130 }
 0x27f   : > { %s2492_s28 = sld [smem:[#allocation24_spill]] }
 0x280   : > { %s2493_s29 = sld [smem:[#allocation25_spill]]  ;;  %s2495_s22 = smov %s2487_s8 }
 0x281   : > { %s2497_s24 = smov %s2488_s6 }
 0x283   :  { %1207 = vsyncpa [#allocation3], 1 }
 0x284   :  { %1209 = vsyncpa [#allocation3 + $0x1], 1 }
 0x285   :  { %1210 = vsyncpa [#allocation6], 1 }
 0x286   :  { %1212 = vsyncpa [#allocation6 + $0x1], 1 }
 0x287   :  { %1213 = vsyncpa [#allocation9], 1 }
 0x288   :  { %1215 = vsyncpa [#allocation9 + $0x1], 1 }
 0x289   :  { %1216 = vsyncpa [#allocation12], 1 }
 0x28a   :  { %1217 = vsyncpa [#allocation4], 1 }
 0x28b   :  { %1219 = vsyncpa [#allocation4 + $0x1], 1 }

</bundles_post_ra>
